<compile_context>
chip_gen: v6e
topology: v6e:2x2x1
jax: 0.10.0
libtpu: 0.0.40
codegen_flags: <defaults>
</compile_context>

<pallas_src>
import functools

import jax
import jax.numpy as jnp
from jax.experimental import pallas as pl
from jax.experimental.pallas import tpu as pltpu

T_LEN = 8      # `length` (== T of the input)
C_EMB = 256    # channel dim of z (Embed([length, 64, 256]) output)
C_OUT = 512    # tcn2 output channels
EPS = 1e-5


def frame_level_kernel(z_ref, e_ref, w1_ref, t1_ref, w2_ref, t2_ref, o_ref,
                       *, seq_len):
    # z_ref : (V, R, C)   f32, R = B*seq_len (B sequences, seq_len frames each)
    # e_ref : (R, C)      f32, frame embedding tiled over the B sequences
    # w1_ref: (3C, C)     bf16, k=3 conv taps stacked along rows (k=0,1,2), BN1 folded
    # t1_ref: (1, C)      f32, conv1 bias + BN1 shift (folded)
    # w2_ref: (C, Cout)   bf16, k=1 conv, BN2 scale folded in
    # t2_ref: (1, Cout)   f32, conv2 bias + BN2 shift (folded)
    # o_ref : (B, Cout)   f32
    V, R, C = z_ref.shape
    B, Cout = o_ref.shape
    T = seq_len

    # z = z + embed(f); z = z.max(dim=V)  (embedding is V-independent -> max first)
    y = z_ref[0]
    for v in range(1, V):                       # V-1 pure-VPU maximums
        y = jnp.maximum(y, z_ref[v])
    y = y + e_ref[...]                          # (R, C) f32

    # Conv1d(k=3, padding=1): shifted copies, zeroed at every sequence boundary
    # (mask on (row % T), not only row 0 / row R-1 -> no cross-sequence leak).
    t_idx = jax.lax.broadcasted_iota(jnp.int32, (R, C), 0) % T
    y_prev = jnp.where(t_idx == 0, 0.0, pltpu.roll(y, shift=1, axis=0))
    y_next = jnp.where(t_idx == T - 1, 0.0, pltpu.roll(y, shift=R - 1, axis=0))

    # Three accumulated MXU matmuls against static row-slices of w1 (k=0,1,2).
    # Row offsets are multiples of C=256 -> (8,128)-aligned slices, zero-cost views.
    x1 = jnp.dot(y.astype(jnp.bfloat16), w1_ref[C:2 * C, :],
                 preferred_element_type=jnp.float32)
    x1 = x1 + jnp.dot(y_prev.astype(jnp.bfloat16), w1_ref[0:C, :],
                      preferred_element_type=jnp.float32)
    x1 = x1 + jnp.dot(y_next.astype(jnp.bfloat16), w1_ref[2 * C:3 * C, :],
                      preferred_element_type=jnp.float32)
    x1 = jnp.maximum(x1 + t1_ref[...], 0.0)     # BN1 (folded) + ReLU, f32

    # Dropout(0.2): identity in eval mode.
    # tcn2: Conv1d(k=1) == matmul, BN2 (folded) + ReLU.
    x2 = jnp.dot(x1.astype(jnp.bfloat16), w2_ref[...],
                 preferred_element_type=jnp.float32)
    x2 = jnp.maximum(x2 + t2_ref[...], 0.0)     # (R, Cout) f32

    # z = x.max(dim=T) per sequence -> full (B, Cout) tile store.
    o_ref[...] = jnp.max(x2.reshape(B, T, Cout), axis=1)


def _pick_seq_batch(nm, t, target_rows=256):
    """Largest divisor B of N*M with B*T <= target_rows; multi-block grids also
    need B % 8 == 0 so output stores are sublane-aligned."""
    best = 1
    for b in range(1, nm + 1):
        if nm % b:
            continue
        if b * t > max(target_rows, t):
            continue
        if nm // b > 1 and b % 8 != 0:
            continue
        best = b
    return best


def frame_level_forward(z, e, w1, t1, w2, t2, *, target_rows=256):
    """z: (N, T, M, V, C) f32 -> (N, M, C_out) f32."""
    N, T, M, V, C = z.shape
    Cout = w2.shape[-1]
    NM = N * M

    # target_rows: 256 saturates v6e/v7x MXU rows; 128 already saturates v5e.
    # With large N*M this also yields G >= 2 parallel grid steps (v7x: 2 TCs).
    B = _pick_seq_batch(NM, T, target_rows)
    G = NM // B
    R = B * T

    # (N, T, M, V, C) -> (G, V, R, C): V outermost inside each block.
    zb = jnp.transpose(z, (0, 2, 3, 1, 4))      # (N, M, V, T, C)
    zb = zb.reshape(G, B, V, T, C)
    zb = jnp.transpose(zb, (0, 2, 1, 3, 4))     # (G, V, B, T, C)
    zb = zb.reshape(G, V, R, C)

    e_tiled = jnp.tile(e, (B, 1))               # (R, C)

    def const_spec(shape):
        # NOTE: constant index_map => never re-DMAed across the grid.
        return pl.BlockSpec(shape, lambda g: (0,) * len(shape))

    out = pl.pallas_call(
        functools.partial(frame_level_kernel, seq_len=T),
        out_shape=jax.ShapeDtypeStruct((NM, Cout), jnp.float32),
        grid_spec=pltpu.PrefetchScalarGridSpec(
            num_scalar_prefetch=0,
            grid=(G,),
            in_specs=[
                pl.BlockSpec((None, V, R, C), lambda g: (g, 0, 0, 0)),
                const_spec((R, C)),
                const_spec((3 * C, C)),
                const_spec((1, C)),
                const_spec((C, Cout)),
                const_spec((1, Cout)),
            ],
            out_specs=pl.BlockSpec((B, Cout), lambda g: (g, 0)),
        ),
        compiler_params=pltpu.CompilerParams(
            dimension_semantics=("parallel",)),
    )(zb, e_tiled, w1, t1, w2, t2)
    return out.reshape(N, M, Cout)


def fold_params(wc1, bc1, g1, beta1, mu1, var1,
                wc2, bc2, g2, beta2, mu2, var2, eps=EPS):
    """Fold eval-mode BatchNorm + conv bias into (bf16 weight, f32 shift)."""
    s1 = g1 / jnp.sqrt(var1 + eps)                                   # (C,)
    w1 = jnp.transpose(wc1, (2, 1, 0)).reshape(-1, wc1.shape[0])     # (3*Cin, Cout)
    w1 = (w1 * s1[None, :]).astype(jnp.bfloat16)
    t1 = (beta1 + (bc1 - mu1) * s1)[None, :]                         # (1, C)

    s2 = g2 / jnp.sqrt(var2 + eps)                                   # (Cout,)
    w2 = (jnp.transpose(wc2[:, :, 0]) * s2[None, :]).astype(jnp.bfloat16)
    t2 = (beta2 + (bc2 - mu2) * s2)[None, :]                         # (1, Cout)
    return w1, t1, w2, t2


def reference_forward(z, e, wc1, bc1, g1, beta1, mu1, var1,
                      wc2, bc2, g2, beta2, mu2, var2, eps=EPS):
    """Pure-JAX, full-precision mirror of the PyTorch forward (eval mode)."""
    N, T, M, V, C = z.shape
    hp = jax.lax.Precision.HIGHEST
    zz = z + e[None, :, None, None, :]
    zz = jnp.max(zz, axis=-2)                                        # (N, T, M, C)
    x = jnp.transpose(zz, (0, 2, 3, 1)).reshape(N * M, C, T)         # NCT
    x = jax.lax.conv_general_dilated(
        x, wc1, window_strides=(1,), padding='SAME',
        dimension_numbers=('NCH', 'OIH', 'NCH'),
        precision=hp) + bc1[None, :, None]
    x = ((x - mu1[None, :, None]) / jnp.sqrt(var1 + eps)[None, :, None]
         * g1[None, :, None] + beta1[None, :, None])
    x = jnp.maximum(x, 0.0)
    # dropout: identity (eval)
    x = jnp.einsum('oc,nct->not', wc2[:, :, 0], x,
                   precision=hp) + bc2[None, :, None]
    x = ((x - mu2[None, :, None]) / jnp.sqrt(var2 + eps)[None, :, None]
         * g2[None, :, None] + beta2[None, :, None])
    x = jnp.maximum(x, 0.0)
    x = x.reshape(N, M, -1, T)
    return jnp.max(x, axis=-1)                                       # (N, M, 512)


if __name__ == "__main__":
    N, M, V = 2, 2, 4
    T, C = T_LEN, C_EMB

    key = jax.random.PRNGKey(0)
    ks = jax.random.split(key, 20)

    def unif(k, shape, scale=1.0):
        return (jax.random.uniform(k, shape, dtype=jnp.float32) * 2.0 - 1.0) * scale

    # ---- deterministic parameters ----
    # Embed([T, 64, 256]): Linear(T,64)+ReLU, Linear(64,256)+ReLU
    we1 = unif(ks[0], (64, T), (1.0 / T) ** 0.5)
    be1 = unif(ks[1], (64,), (1.0 / T) ** 0.5)
    we2 = unif(ks[2], (C, 64), (1.0 / 64) ** 0.5)
    be2 = unif(ks[3], (C,), (1.0 / 64) ** 0.5)
    # tcn1: Conv1d(256,256,3,pad=1) + BN(256)
    wc1 = unif(ks[4], (C, C, 3), (1.0 / (C * 3)) ** 0.5)
    bc1 = unif(ks[5], (C,), (1.0 / (C * 3)) ** 0.5)
    g1 = 1.0 + 0.1 * unif(ks[6], (C,))
    beta1 = 0.1 * unif(ks[7], (C,))
    mu1 = 0.1 * unif(ks[8], (C,))
    var1 = 0.5 + jnp.abs(unif(ks[9], (C,)))
    # tcn2: Conv1d(256,512,1) + BN(512)
    wc2 = unif(ks[10], (C_OUT, C, 1), (1.0 / C) ** 0.5)
    bc2 = unif(ks[11], (C_OUT,), (1.0 / C) ** 0.5)
    g2 = 1.0 + 0.1 * unif(ks[12], (C_OUT,))
    beta2 = 0.1 * unif(ks[13], (C_OUT,))
    mu2 = 0.1 * unif(ks[14], (C_OUT,))
    var2 = 0.5 + jnp.abs(unif(ks[15], (C_OUT,)))

    # ---- input z: (N, T, M, V, C), T == length, C == 256 ----
    z = unif(ks[16], (N, T, M, V, C))

    # ---- glue: frame embedding of the constant one-hot buffer `f` ----
    one_hot = jnp.eye(T, dtype=jnp.float32)
    h = jnp.maximum(one_hot @ we1.T + be1, 0.0)
    e = jnp.maximum(h @ we2.T + be2, 0.0)                            # (T, 256)

    # ---- glue: fold conv bias + eval-mode BN into (bf16 weight, f32 shift) ----
    w1, t1, w2, t2 = fold_params(wc1, bc1, g1, beta1, mu1, var1,
                                 wc2, bc2, g2, beta2, mu2, var2)

    out = frame_level_forward(z, e, w1, t1, w2, t2)
    out = jax.block_until_ready(out)

    ref = reference_forward(z, e, wc1, bc1, g1, beta1, mu1, var1,
                            wc2, bc2, g2, beta2, mu2, var2)
    ref = jax.block_until_ready(ref)

    assert out.shape == (N, M, C_OUT), out.shape
    # bf16 MXU operands (f32 accumulate) compared against a full-f32 reference.
    if not bool(jnp.allclose(out, ref, atol=2e-2, rtol=2e-2)):
        raise AssertionError(
            f"mismatch: max abs err = {float(jnp.max(jnp.abs(out - ref)))}")
    print("KERNEL_OK")
</pallas_src>

<mosaic_0001>
module attributes {stable_mosaic.version = 11 : i64} {
  func.func @frame_level_kernel(%arg0: i32, %arg1: memref<1x4x32x256xf32, #tpu.memory_space<vmem>>, %arg2: memref<32x256xf32, #tpu.memory_space<vmem>>, %arg3: memref<768x256xbf16, #tpu.memory_space<vmem>>, %arg4: memref<1x256xf32, #tpu.memory_space<vmem>>, %arg5: memref<256x512xbf16, #tpu.memory_space<vmem>>, %arg6: memref<1x512xf32, #tpu.memory_space<vmem>>, %arg7: memref<4x512xf32, #tpu.memory_space<vmem>>) attributes {dimension_semantics = [#tpu.dimension_semantics<parallel>], iteration_bounds = array<i64: 1>, scalar_prefetch = 0 : i64, scratch_operands = 0 : i64, tpu.core_type = #tpu.core_type<tc>, window_params = [{transform_indices = @transform_0, window_bounds = array<i64: 1, 4, 32, 256>}, {pipeline_mode = #tpu.pipeline_mode<synchronous>, transform_indices = @transform_1, window_bounds = array<i64: 32, 256>}, {pipeline_mode = #tpu.pipeline_mode<synchronous>, transform_indices = @transform_2, window_bounds = array<i64: 768, 256>}, {pipeline_mode = #tpu.pipeline_mode<synchronous>, transform_indices = @transform_3, window_bounds = array<i64: 1, 256>}, {pipeline_mode = #tpu.pipeline_mode<synchronous>, transform_indices = @transform_4, window_bounds = array<i64: 256, 512>}, {pipeline_mode = #tpu.pipeline_mode<synchronous>, transform_indices = @transform_5, window_bounds = array<i64: 1, 512>}, {transform_indices = @transform_6, window_bounds = array<i64: 4, 512>}]} {
    %c0 = arith.constant 0 : index
    %c0_0 = arith.constant 0 : index
    %c0_1 = arith.constant 0 : index
    %c0_2 = arith.constant 0 : index
    %0 = vector.load %arg1[%c0, %c0_0, %c0_1, %c0_2] : memref<1x4x32x256xf32, #tpu.memory_space<vmem>>, vector<1x1x32x256xf32>
    %1 = vector.shape_cast %0 : vector<1x1x32x256xf32> to vector<32x256xf32>
    %c0_3 = arith.constant 0 : index
    %c1 = arith.constant 1 : index
    %c0_4 = arith.constant 0 : index
    %c0_5 = arith.constant 0 : index
    %2 = vector.load %arg1[%c0_3, %c1, %c0_4, %c0_5] : memref<1x4x32x256xf32, #tpu.memory_space<vmem>>, vector<1x1x32x256xf32>
    %3 = vector.shape_cast %2 : vector<1x1x32x256xf32> to vector<32x256xf32>
    %4 = arith.maximumf %1, %3 : vector<32x256xf32>
    %c0_6 = arith.constant 0 : index
    %c2 = arith.constant 2 : index
    %c0_7 = arith.constant 0 : index
    %c0_8 = arith.constant 0 : index
    %5 = vector.load %arg1[%c0_6, %c2, %c0_7, %c0_8] : memref<1x4x32x256xf32, #tpu.memory_space<vmem>>, vector<1x1x32x256xf32>
    %6 = vector.shape_cast %5 : vector<1x1x32x256xf32> to vector<32x256xf32>
    %7 = arith.maximumf %4, %6 : vector<32x256xf32>
    %c0_9 = arith.constant 0 : index
    %c3 = arith.constant 3 : index
    %c0_10 = arith.constant 0 : index
    %c0_11 = arith.constant 0 : index
    %8 = vector.load %arg1[%c0_9, %c3, %c0_10, %c0_11] : memref<1x4x32x256xf32, #tpu.memory_space<vmem>>, vector<1x1x32x256xf32>
    %9 = vector.shape_cast %8 : vector<1x1x32x256xf32> to vector<32x256xf32>
    %10 = arith.maximumf %7, %9 : vector<32x256xf32>
    %c0_12 = arith.constant 0 : index
    %c0_13 = arith.constant 0 : index
    %11 = vector.load %arg2[%c0_12, %c0_13] : memref<32x256xf32, #tpu.memory_space<vmem>>, vector<32x256xf32>
    %12 = arith.addf %10, %11 : vector<32x256xf32>
    %13 = tpu.iota {dimensions = array<i32: 0>} : vector<32x256xi32>
    %c8_i32 = arith.constant 8 : i32
    %c0_i32 = arith.constant 0 : i32
    %14 = arith.cmpi eq, %c8_i32, %c0_i32 : i32
    %c1_i32 = arith.constant 1 : i32
    %15 = arith.select %14, %c1_i32, %c8_i32 : i32
    %16 = vector.broadcast %15 : i32 to vector<32x256xi32>
    %17 = arith.remsi %13, %16 : vector<32x256xi32>
    %c0_i32_14 = arith.constant 0 : i32
    %18 = vector.broadcast %c0_i32_14 : i32 to vector<32x256xi32>
    %19 = arith.cmpi ne, %17, %18 : vector<32x256xi32>
    %c0_i32_15 = arith.constant 0 : i32
    %20 = vector.broadcast %c0_i32_15 : i32 to vector<32x256xi32>
    %21 = arith.cmpi slt, %17, %20 : vector<32x256xi32>
    %c0_i32_16 = arith.constant 0 : i32
    %22 = arith.cmpi slt, %15, %c0_i32_16 : i32
    %23 = vector.broadcast %22 : i1 to vector<32x256xi1>
    %24 = vector.broadcast %23 : vector<32x256xi1> to vector<32x256xi1>
    %25 = arith.xori %21, %24 : vector<32x256xi1>
    %26 = arith.andi %25, %19 : vector<32x256xi1>
    %27 = vector.broadcast %15 : i32 to vector<32x256xi32>
    %28 = arith.addi %17, %27 : vector<32x256xi32>
    %29 = arith.select %26, %28, %17 : vector<32x256xi1>, vector<32x256xi32>
    %c0_i32_17 = arith.constant 0 : i32
    %30 = vector.broadcast %c0_i32_17 : i32 to vector<32x256xi32>
    %31 = arith.cmpi eq, %29, %30 : vector<32x256xi32>
    %c1_i32_18 = arith.constant 1 : i32
    %32 = tpu.dynamic_rotate %12 by %c1_i32_18 dim 0 : vector<32x256xf32>, i32 -> vector<32x256xf32>
    %cst = arith.constant 0.000000e+00 : f32
    %33 = vector.broadcast %cst : f32 to vector<32x256xf32>
    %34 = arith.select %31, %33, %32 : vector<32x256xi1>, vector<32x256xf32>
    %c7_i32 = arith.constant 7 : i32
    %35 = vector.broadcast %c7_i32 : i32 to vector<32x256xi32>
    %36 = arith.cmpi eq, %29, %35 : vector<32x256xi32>
    %c31_i32 = arith.constant 31 : i32
    %37 = tpu.dynamic_rotate %12 by %c31_i32 dim 0 : vector<32x256xf32>, i32 -> vector<32x256xf32>
    %cst_19 = arith.constant 0.000000e+00 : f32
    %38 = vector.broadcast %cst_19 : f32 to vector<32x256xf32>
    %39 = arith.select %36, %38, %37 : vector<32x256xi1>, vector<32x256xf32>
    %40 = arith.truncf %12 : vector<32x256xf32> to vector<32x256xbf16>
    %c256 = arith.constant 256 : index
    %c0_20 = arith.constant 0 : index
    %41 = vector.load %arg3[%c256, %c0_20] : memref<768x256xbf16, #tpu.memory_space<vmem>>, vector<256x256xbf16>
    %cst_21 = arith.constant dense<0.000000e+00> : vector<32x256xf32>
    %42 = tpu.matmul %40, %41, %cst_21 {dimension_numbers = #tpu.dot_dimension_numbers<[1], [0], [0], [1], [0, 0, 1, 1], [], []>} : vector<32x256xbf16>, vector<256x256xbf16>, vector<32x256xf32> -> vector<32x256xf32>
    %43 = arith.truncf %34 : vector<32x256xf32> to vector<32x256xbf16>
    %c0_22 = arith.constant 0 : index
    %c0_23 = arith.constant 0 : index
    %44 = vector.load %arg3[%c0_22, %c0_23] : memref<768x256xbf16, #tpu.memory_space<vmem>>, vector<256x256xbf16>
    %cst_24 = arith.constant dense<0.000000e+00> : vector<32x256xf32>
    %45 = tpu.matmul %43, %44, %cst_24 {dimension_numbers = #tpu.dot_dimension_numbers<[1], [0], [0], [1], [0, 0, 1, 1], [], []>} : vector<32x256xbf16>, vector<256x256xbf16>, vector<32x256xf32> -> vector<32x256xf32>
    %46 = arith.addf %42, %45 : vector<32x256xf32>
    %47 = arith.truncf %39 : vector<32x256xf32> to vector<32x256xbf16>
    %c512 = arith.constant 512 : index
    %c0_25 = arith.constant 0 : index
    %48 = vector.load %arg3[%c512, %c0_25] : memref<768x256xbf16, #tpu.memory_space<vmem>>, vector<256x256xbf16>
    %cst_26 = arith.constant dense<0.000000e+00> : vector<32x256xf32>
    %49 = tpu.matmul %47, %48, %cst_26 {dimension_numbers = #tpu.dot_dimension_numbers<[1], [0], [0], [1], [0, 0, 1, 1], [], []>} : vector<32x256xbf16>, vector<256x256xbf16>, vector<32x256xf32> -> vector<32x256xf32>
    %50 = arith.addf %46, %49 : vector<32x256xf32>
    %c0_27 = arith.constant 0 : index
    %c0_28 = arith.constant 0 : index
    %51 = vector.load %arg4[%c0_27, %c0_28] : memref<1x256xf32, #tpu.memory_space<vmem>>, vector<1x256xf32>
    %52 = vector.broadcast %51 : vector<1x256xf32> to vector<32x256xf32>
    %53 = arith.addf %50, %52 : vector<32x256xf32>
    %cst_29 = arith.constant 0.000000e+00 : f32
    %54 = vector.broadcast %cst_29 : f32 to vector<32x256xf32>
    %55 = arith.maximumf %53, %54 : vector<32x256xf32>
    %56 = arith.truncf %55 : vector<32x256xf32> to vector<32x256xbf16>
    %c0_30 = arith.constant 0 : index
    %c0_31 = arith.constant 0 : index
    %57 = vector.load %arg5[%c0_30, %c0_31] : memref<256x512xbf16, #tpu.memory_space<vmem>>, vector<256x512xbf16>
    %cst_32 = arith.constant dense<0.000000e+00> : vector<32x512xf32>
    %58 = tpu.matmul %56, %57, %cst_32 {dimension_numbers = #tpu.dot_dimension_numbers<[1], [0], [0], [1], [0, 0, 1, 1], [], []>} : vector<32x256xbf16>, vector<256x512xbf16>, vector<32x512xf32> -> vector<32x512xf32>
    %c0_33 = arith.constant 0 : index
    %c0_34 = arith.constant 0 : index
    %59 = vector.load %arg6[%c0_33, %c0_34] : memref<1x512xf32, #tpu.memory_space<vmem>>, vector<1x512xf32>
    %60 = vector.broadcast %59 : vector<1x512xf32> to vector<32x512xf32>
    %61 = arith.addf %58, %60 : vector<32x512xf32>
    %cst_35 = arith.constant 0.000000e+00 : f32
    %62 = vector.broadcast %cst_35 : f32 to vector<32x512xf32>
    %63 = arith.maximumf %61, %62 : vector<32x512xf32>
    %64 = vector.shape_cast %63 : vector<32x512xf32> to vector<4x8x512xf32>
    %cst_36 = arith.constant dense<0xFF800000> : vector<4x512xf32>
    %65 = vector.multi_reduction <maximumf>, %64, %cst_36 [1] : vector<4x8x512xf32> to vector<4x512xf32>
    %c0_37 = arith.constant 0 : index
    %c0_38 = arith.constant 0 : index
    %66 = vector.load %arg7[%c0_37, %c0_38] : memref<4x512xf32, #tpu.memory_space<vmem>>, vector<4x512xf32>
    tpu.vector_store %arg7[%c0_37, %c0_38], %65 {strides = array<i32>} : memref<4x512xf32, #tpu.memory_space<vmem>>, vector<4x512xf32>,
    return
  }
  func.func @transform_0(%arg0: i32) -> (i32, i32, i32, i32) {
    %c0_i32 = arith.constant 0 : i32
    %c0_i32_0 = arith.constant 0 : i32
    %c0_i32_1 = arith.constant 0 : i32
    %c0_i32_2 = arith.constant 0 : i32
    return %arg0, %c0_i32, %c0_i32_0, %c0_i32_1 : i32, i32, i32, i32
  }
  func.func @transform_1(%arg0: i32) -> (i32, i32) {
    %c0_i32 = arith.constant 0 : i32
    %c0_i32_0 = arith.constant 0 : i32
    %c0_i32_1 = arith.constant 0 : i32
    return %c0_i32, %c0_i32_0 : i32, i32
  }
  func.func @transform_2(%arg0: i32) -> (i32, i32) {
    %c0_i32 = arith.constant 0 : i32
    %c0_i32_0 = arith.constant 0 : i32
    %c0_i32_1 = arith.constant 0 : i32
    return %c0_i32, %c0_i32_0 : i32, i32
  }
  func.func @transform_3(%arg0: i32) -> (i32, i32) {
    %c0_i32 = arith.constant 0 : i32
    %c0_i32_0 = arith.constant 0 : i32
    %c0_i32_1 = arith.constant 0 : i32
    return %c0_i32, %c0_i32_0 : i32, i32
  }
  func.func @transform_4(%arg0: i32) -> (i32, i32) {
    %c0_i32 = arith.constant 0 : i32
    %c0_i32_0 = arith.constant 0 : i32
    %c0_i32_1 = arith.constant 0 : i32
    return %c0_i32, %c0_i32_0 : i32, i32
  }
  func.func @transform_5(%arg0: i32) -> (i32, i32) {
    %c0_i32 = arith.constant 0 : i32
    %c0_i32_0 = arith.constant 0 : i32
    %c0_i32_1 = arith.constant 0 : i32
    return %c0_i32, %c0_i32_0 : i32, i32
  }
  func.func @transform_6(%arg0: i32) -> (i32, i32) {
    %c0_i32 = arith.constant 0 : i32
    %c0_i32_0 = arith.constant 0 : i32
    return %arg0, %c0_i32 : i32, i32
  }
}

</mosaic_0001>

<bundles_post_ra>
// kernel: tpu_custom_call.1
= control target key start
LH: loop header
LB: loop body
LE: loop exit
PB: predicated region body
PF: predicated region fallthrough
CT: control target
= control target key end

     0   :  { %11 = vsyncpa [#allocation3], 0  ;;  %s2773_s0 = inlined_call_operand.hbm [shape: f32[1,4,32,256], index: 0, kind: input, shape index: {}]   ;;  %s2774_s1 = inlined_call_operand.hbm [shape: f32[32,256], index: 1, kind: input, shape index: {}]   ;;  %s2775_s2 = inlined_call_operand.hbm [shape: bf16[768,256], index: 2, kind: input, shape index: {}]   ;;  %s2776_s3 = inlined_call_operand.vmem [shape: f32[1,256], index: 3, kind: input, shape index: {}]   ;;  %s2777_s4 = inlined_call_operand.hbm [shape: bf16[256,512], index: 4, kind: input, shape index: {}]   ;;  %s2778_s5 = inlined_call_operand.vmem [shape: f32[1,512], index: 5, kind: input, shape index: {}]   ;;  %s2779_s6 = inlined_call_operand.hbm [shape: f32[4,512], index: 6, kind: output, shape index: {}]  }
   0x1   :  { %12 = vsyncpa [#allocation6], 0 }
   0x2   :  { %13 = vsyncpa [#allocation9], 0 }
   0x3   :  { %14 = vsyncpa [#allocation4], 0  ;;  %s2342_s21 = smov [#allocation5]   ;;  %s2343_s23 = smov [#allocation2]  }
   0x4   :  { %s32_s22 = sshll.u32 %s2342_s21, 4  ;;  %s20_s24 = sshll.u32 %s2343_s23, 4  ;;  %s33_s22 = int_to_ptr.vmem [resolvable:$true] %s32_s22  ;;  %s21_s24 = int_to_ptr.vmem [resolvable:$true] %s20_s24 }
   0x5   :  { %s2242_s25 = scalar_lea.vmem %s33_s22, 1024  ;;  %p2247_p1 = scmp.lt.s32.totalorder %s33_s22, %s33_s22 }
   0x6   :  { %p2243_p0 = scmp.ne.s32.totalorder %s33_s22, %s2242_s25  ;;  %p2248_p2 = scmp.lt.s32.totalorder %s2242_s25, %s2242_s25 }
   0x8   :  { %p2249_p3 = por %p2248_p2, %p2247_p1 }
   0xa   :  { %p2250_p4 = pnand %p2249_p3, %p2243_p0 }
   0xc   :  { %2253 = shalt.err (!%p2250_p4)
}
   0xd   :  { %s2344_s26 = smov 256   ;;  %s2345_s27 = smov 16  }
   0xe   :  { %38 = dma.hbm_to_vmem [thread:$0]  %s2774_s1, 1024, %s33_s22, [#allocation6], %s2344_s26, %s2344_s26, %s2345_s27  }
   0xf   :  { %s2262_s30 = scalar_lea.vmem %s21_s24, 4096  ;;  %p2267_p6 = scmp.lt.s32.totalorder %s21_s24, %s21_s24 }
  0x10   :  { %p2263_p5 = scmp.ne.s32.totalorder %s21_s24, %s2262_s30  ;;  %p2268_p7 = scmp.lt.s32.totalorder %s2262_s30, %s2262_s30 }
  0x12   :  { %p2269_p8 = por %p2268_p7, %p2267_p6 }
  0x14   :  { %p2270_p9 = pnand %p2269_p8, %p2263_p5 }
  0x16   :  { %2273 = shalt.err (!%p2270_p9)
}
  0x17   :  { %26 = dma.hbm_to_vmem [thread:$0]  %s2773_s0, 4096, %s21_s24, [#allocation3], %s2344_s26, %s2344_s26, %s2345_s27  }
  0x18   :  { %s2346_s9 = smov [#allocation7]  }
  0x19   :  { %s44_s10 = sshll.u32 %s2346_s9, 4  ;;  %s45_s10 = int_to_ptr.vmem [resolvable:$true] %s44_s10 }
  0x1a   :  { %s2282_s11 = scalar_lea.vmem %s45_s10, 12288  ;;  %p2287_p11 = scmp.lt.s32.totalorder %s45_s10, %s45_s10 }
  0x1b   :  { %p2283_p10 = scmp.ne.s32.totalorder %s45_s10, %s2282_s11  ;;  %p2288_p12 = scmp.lt.s32.totalorder %s2282_s11, %s2282_s11 }
  0x1d   :  { %p2289_p13 = por %p2288_p12, %p2287_p11 }
  0x1f   :  { %p2290_p0 = pnand %p2289_p13, %p2283_p10 }
  0x21   :  { %2293 = shalt.err (!%p2290_p0)
}
  0x22   :  { %s2347_s1 = smov 128   ;;  %s2348_s12 = smov 8  }
  0x23   :  { %50 = dma.hbm_to_vmem [thread:$0]  %s2775_s2, 12288, %s45_s10, [#allocation6], %s2347_s1, %s2347_s1, %s2348_s12  }
  0x24   :  { %s2349_s15 = smov [#allocation8]  }
  0x25   :  { %s58_s16 = sshll.u32 %s2349_s15, 4  ;;  %s59_s16 = int_to_ptr.vmem [resolvable:$true] %s58_s16 }
  0x26   :  { %s2302_s0 = scalar_lea.vmem %s59_s16, 8192  ;;  %p2307_p2 = scmp.lt.s32.totalorder %s59_s16, %s59_s16 }
  0x27   :  { %p2303_p1 = scmp.ne.s32.totalorder %s59_s16, %s2302_s0  ;;  %p2308_p3 = scmp.lt.s32.totalorder %s2302_s0, %s2302_s0 }
  0x29   :  { %p2309_p4 = por %p2308_p3, %p2307_p2 }
  0x2b   :  { %p2310_p5 = pnand %p2309_p4, %p2303_p1 }
  0x2d   :  { %2313 = shalt.err (!%p2310_p5)
}
  0x2e   :  { %64 = dma.hbm_to_vmem [thread:$0]  %s2777_s4, 8192, %s59_s16, [#allocation9], %s2344_s26, %s2344_s26, %s2345_s27  }
  0x2f   :  { %2334 = dma.done.wait [#allocation3], 4096  }
  0x30   :  { %2335 = vsyncadd [#allocation3], 4294963200 }
  0x31   :  { %2336 = dma.done.wait [#allocation6], 13312  }
  0x32   :  { %2337 = vsyncadd [#allocation6], 4294953984 }
  0x33   :  { %2338 = dma.done.wait [#allocation9], 8192  }
  0x34   :  { %2339 = vsyncadd [#allocation9], 4294959104  ;;  %v1994_v0 = vld [vmem:[#allocation7 + $0x74] ss:$8 sps:$4 sm:$0xff]   ;;  %v1998_v2 = vld [vmem:[#allocation7 + $0x70] ss:$8 sps:$4 sm:$0xff]   ;;  %v154_v39 = vlaneseq }
  0x35   :  { %v1996_v1 = vld [vmem:[#allocation7 + $0x174] ss:$8 sps:$4 sm:$0xff]   ;;  %497 = vmatprep.subr.bf16.mxu0 %v1994_v0  ;;  %v1999_v3 = vld [vmem:[#allocation7 + $0x170] ss:$8 sps:$4 sm:$0xff]   ;;  %v2000_v4 = vld [vmem:[#allocation7 + $0x64] ss:$8 sps:$4 sm:$0xff]  }
  0x36   :  { %710 = vmatprep.subr.bf16.mxu1 %v1996_v1  ;;  %498 = vmatpush1.bf16.msra.mxu0 %v1998_v2  ;;  %v2002_v5 = vld [vmem:[#allocation7 + $0x164] ss:$8 sps:$4 sm:$0xff]   ;;  %v2004_v6 = vld [vmem:[#allocation7 + $0x60] ss:$8 sps:$4 sm:$0xff]   ;;  %v2006_v8 = vld [vmem:[#allocation7 + $0x54] ss:$8 sps:$4 sm:$0xff]  }
  0x37   :  { %711 = vmatpush1.bf16.msra.mxu1 %v1999_v3  ;;  %499 = vmatprep.subr.bf16.mxu0 %v2000_v4  ;;  %v2005_v7 = vld [vmem:[#allocation7 + $0x160] ss:$8 sps:$4 sm:$0xff]   ;;  %v2008_v9 = vld [vmem:[#allocation7 + $0x154] ss:$8 sps:$4 sm:$0xff]   ;;  %v2010_v10 = vld [vmem:[#allocation7 + $0x50] ss:$8 sps:$4 sm:$0xff]  }
  0x38   :  { %712 = vmatprep.subr.bf16.mxu1 %v2002_v5  ;;  %v2011_v11 = vld [vmem:[#allocation7 + $0x150] ss:$8 sps:$4 sm:$0xff]   ;;  %v2012_v12 = vld [vmem:[#allocation7 + $0x44] ss:$8 sps:$4 sm:$0xff]   ;;  %v2016_v14 = vld [vmem:[#allocation7 + $0x40] ss:$8 sps:$4 sm:$0xff]  }
  0x39   :  { %v2014_v13 = vld [vmem:[#allocation7 + $0x144] ss:$8 sps:$4 sm:$0xff]   ;;  %v2017_v15 = vld [vmem:[#allocation7 + $0x140] ss:$8 sps:$4 sm:$0xff]   ;;  %v2018_v16 = vld [vmem:[#allocation7 + $0x34] ss:$8 sps:$4 sm:$0xff]  }
  0x3a   :  { %500 = vmatpush1.bf16.msra.mxu0 %v2004_v6  ;;  %v2020_v17 = vld [vmem:[#allocation7 + $0x134] ss:$8 sps:$4 sm:$0xff]   ;;  %v2022_v18 = vld [vmem:[#allocation7 + $0x30] ss:$8 sps:$4 sm:$0xff]   ;;  %v2024_v20 = vld [vmem:[#allocation7 + $0x24] ss:$8 sps:$4 sm:$0xff]  }
  0x3b   :  { %713 = vmatpush1.bf16.msra.mxu1 %v2005_v7  ;;  %501 = vmatprep.subr.bf16.mxu0 %v2006_v8  ;;  %v2023_v19 = vld [vmem:[#allocation7 + $0x130] ss:$8 sps:$4 sm:$0xff]   ;;  %v2026_v21 = vld [vmem:[#allocation7 + $0x124] ss:$8 sps:$4 sm:$0xff]   ;;  %v2028_v22 = vld [vmem:[#allocation7 + $0x20] ss:$8 sps:$4 sm:$0xff]  }
  0x3c   :  { %714 = vmatprep.subr.bf16.mxu1 %v2008_v9  ;;  %v2029_v23 = vld [vmem:[#allocation7 + $0x120] ss:$8 sps:$4 sm:$0xff]   ;;  %v2030_v24 = vld [vmem:[#allocation7 + $0x14] ss:$8 sps:$4 sm:$0xff]   ;;  %v2034_v26 = vld [vmem:[#allocation7 + $0x10] ss:$8 sps:$4 sm:$0xff]  }
  0x3d   :  { %v2032_v25 = vld [vmem:[#allocation7 + $0x114] ss:$8 sps:$4 sm:$0xff]   ;;  %v2035_v27 = vld [vmem:[#allocation7 + $0x110] ss:$8 sps:$4 sm:$0xff]   ;;  %v2036_v28 = vld [vmem:[#allocation7 + $0x4] ss:$8 sps:$4 sm:$0xff]  }
  0x3e   :  { %502 = vmatpush1.bf16.msra.mxu0 %v2010_v10  ;;  %v2038_v29 = vld [vmem:[#allocation7 + $0x104] ss:$8 sps:$4 sm:$0xff]   ;;  %v2040_v30 = vld [vmem:[#allocation7] ss:$8 sps:$4 sm:$0xff]   ;;  %v2042_v32 = vld [vmem:[#allocation7 + $0xf4] ss:$8 sps:$4 sm:$0xff]  }
  0x3f   :  { %715 = vmatpush1.bf16.msra.mxu1 %v2011_v11  ;;  %503 = vmatprep.subr.bf16.mxu0 %v2012_v12  ;;  %v2041_v31 = vld [vmem:[#allocation7 + $0x100] ss:$8 sps:$4 sm:$0xff]   ;;  %v2044_v33 = vld [vmem:[#allocation7 + $0x1f4] ss:$8 sps:$4 sm:$0xff]   ;;  %v2046_v34 = vld [vmem:[#allocation7 + $0xf0] ss:$8 sps:$4 sm:$0xff]  }
  0x40   :  { %716 = vmatprep.subr.bf16.mxu1 %v2014_v13  ;;  %v2047_v35 = vld [vmem:[#allocation7 + $0x1f0] ss:$8 sps:$4 sm:$0xff]   ;;  %v2048_v36 = vld [vmem:[#allocation7 + $0xe4] ss:$8 sps:$4 sm:$0xff]   ;;  %v2052_v38 = vld [vmem:[#allocation7 + $0xe0] ss:$8 sps:$4 sm:$0xff]  }
  0x41   :  { %v2050_v37 = vld [vmem:[#allocation7 + $0x1e4] ss:$8 sps:$4 sm:$0xff]   ;;  %v2053_v40 = vld [vmem:[#allocation7 + $0x1e0] ss:$8 sps:$4 sm:$0xff]   ;;  %v2054_v41 = vld [vmem:[#allocation7 + $0xd4] ss:$8 sps:$4 sm:$0xff]  }
  0x42   :  { %504 = vmatpush1.bf16.msra.mxu0 %v2016_v14  ;;  %v2056_v42 = vld [vmem:[#allocation7 + $0x1d4] ss:$8 sps:$4 sm:$0xff]   ;;  %v2058_v43 = vld [vmem:[#allocation7 + $0xd0] ss:$8 sps:$4 sm:$0xff]   ;;  %v2407_v45 = vshrl.u32 %v154_v39, 7  ;;  %v80_v50 = vld [vmem:[#allocation2 + $0x8] sm:$0xff] }
  0x43   :  { %717 = vmatpush1.bf16.msra.mxu1 %v2017_v15  ;;  %505 = vmatprep.subr.bf16.mxu0 %v2018_v16  ;;  %v2059_v44 = vld [vmem:[#allocation7 + $0x1d0] ss:$8 sps:$4 sm:$0xff]   ;;  %v2060_v46 = vld [vmem:[#allocation7 + $0xc4] ss:$8 sps:$4 sm:$0xff]   ;;  %v2064_v48 = vld [vmem:[#allocation7 + $0xc0] ss:$8 sps:$4 sm:$0xff]  }
  0x44   :  { %718 = vmatprep.subr.bf16.mxu1 %v2020_v17  ;;  %2785 = vst [vmem:[#allocation15_spill] sm:$0xff] %v2407_v45  ;;  %v2062_v47 = vld [vmem:[#allocation7 + $0x1c4] ss:$8 sps:$4 sm:$0xff]   ;;  %v2065_v49 = vld [vmem:[#allocation7 + $0x1c0] ss:$8 sps:$4 sm:$0xff]   ;;  %v82_v53 = vld [vmem:[#allocation2 + $0x18] sm:$0xff] }
  0x45   :  { %v2066_v51 = vld [vmem:[#allocation7 + $0xb4] ss:$8 sps:$4 sm:$0xff]   ;;  %v89_v55 = vld [vmem:[#allocation2 + $0x48] sm:$0xff]  ;;  %v2410_v56 = vadd.s32 8, %v2407_v45  ;;  %v2070_v2 = vld [vmem:[#allocation7 + $0xb0] ss:$8 sps:$4 sm:$0xff]  }
  0x46   :  { %506 = vmatpush1.bf16.msra.mxu0 %v2022_v18  ;;  %v2068_v52 = vld [vmem:[#allocation7 + $0x1b4] ss:$8 sps:$4 sm:$0xff]   ;;  %v97_v59 = vmax.f32 %v80_v50, %v89_v55  ;;  %v106_v60 = vld [vmem:[#allocation2 + $0x88] sm:$0xff]  ;;  %v2071_v3 = vld [vmem:[#allocation7 + $0x1b0] ss:$8 sps:$4 sm:$0xff]   ;;  %v163_v14 = vand.u32 7, %v2407_v45 }
  0x47   :  { %719 = vmatpush1.bf16.msra.mxu1 %v2023_v19  ;;  %507 = vmatprep.subr.bf16.mxu0 %v2024_v20  ;;  %v86_v54 = vld [vmem:[#allocation2 + $0x38] sm:$0xff]  ;;  %v123_v1 = vld [vmem:[#allocation2 + $0xc8] sm:$0xff]  ;;  %v170_v15 = vand.u32 7, %v2410_v56  ;;  %v79_v17 = vld [vmem:[#allocation2] sm:$0xff]  ;;  %vm219_vm0 = vcmp.lt.s32.totalorder %v2407_v45, 1  ;;  %vm248_vm4 = vcmp.lt.s32.totalorder %v2407_v45, 7 }
  0x48   :  { %720 = vmatprep.subr.bf16.mxu1 %v2026_v21  ;;  %v91_v57 = vld [vmem:[#allocation2 + $0x58] sm:$0xff]  ;;  %v114_v4 = vmax.f32 %v97_v59, %v106_v60  ;;  %v2072_v7 = vld [vmem:[#allocation7 + $0xa4] ss:$8 sps:$4 sm:$0xff]   ;;  %v81_v18 = vld [vmem:[#allocation2 + $0x10] sm:$0xff]  ;;  %vm2429_vm2 = vcmp.ne.s32.totalorder %v163_v14, 0  ;;  %vm2512_vm7 = vcmp.ne.s32.totalorder %v163_v14, 7 }
  0x49   :  { %v95_v58 = vld [vmem:[#allocation2 + $0x78] sm:$0xff]  ;;  %v99_v61 = vmax.f32 %v82_v53, %v91_v57  ;;  %v2074_v8 = vld [vmem:[#allocation7 + $0x1a4] ss:$8 sps:$4 sm:$0xff]   ;;  %v85_v19 = vld [vmem:[#allocation2 + $0x30] sm:$0xff]  ;;  %vm2423_vm1 = vcmp.ne.s32.totalorder %v170_v15, 0  ;;  %vm2518_vm8 = vcmp.ne.s32.totalorder %v170_v15, 7 }
  0x4a   :  { %508 = vmatpush1.bf16.msra.mxu0 %v2028_v22  ;;  %v103_v62 = vmax.f32 %v86_v54, %v95_v58  ;;  %v108_v63 = vld [vmem:[#allocation2 + $0x98] sm:$0xff]  ;;  %v139_v11 = vld [vmem:[#allocation5 + $0x8] sm:$0xff]  ;;  %v131_v16 = vmax.f32 %v114_v4, %v123_v1  ;;  %v88_v22 = vld [vmem:[#allocation2 + $0x40] sm:$0xff]  ;;  %vm1701_vm14 = vcmask 1041409   ;;  %vm1703_vm15 = vcmask 1045509  }
  0x4b   :  { %721 = vmatpush1.bf16.msra.mxu1 %v2029_v23  ;;  %509 = vmatprep.subr.bf16.mxu0 %v2030_v24  ;;  %v112_v0 = vld [vmem:[#allocation2 + $0xb8] sm:$0xff]  ;;  %v116_v9 = vmax.f32 %v99_v61, %v108_v63  ;;  %v90_v23 = vld [vmem:[#allocation2 + $0x50] sm:$0xff]  ;;  %vm1779_vm3 = vmpackc.low %vm2423_vm1, %vm2429_vm2  ;;  %vm1708_vm1 = vcmask 1046534   ;;  %vm1711_vm2 = vcmask 1043459  }
  0x4c   :  { %722 = vmatprep.subr.bf16.mxu1 %v2032_v25  ;;  %v125_v5 = vld [vmem:[#allocation2 + $0xd8] sm:$0xff]  ;;  %v120_v10 = vmax.f32 %v103_v62, %v112_v0  ;;  %v94_v24 = vld [vmem:[#allocation2 + $0x70] sm:$0xff]  ;;  %v2076_v25 = vld [vmem:[#allocation7 + $0xa0] ss:$8 sps:$4 sm:$0xff]  }
  0x4d   :  { %v129_v6 = vld [vmem:[#allocation2 + $0xf8] sm:$0xff]  ;;  %v133_v20 = vmax.f32 %v116_v9, %v125_v5  ;;  %v124_v39 = vld [vmem:[#allocation2 + $0xd0] sm:$0xff]  ;;  %v2084_v62 = vld [vmem:[#allocation7 + $0x84] ss:$8 sps:$4 sm:$0xff]  }
  0x4e   :  { %510 = vmatpush1.bf16.msra.mxu0 %v2034_v26  ;;  %v141_v12 = vld [vmem:[#allocation5 + $0x18] sm:$0xff]  ;;  %v137_v21 = vmax.f32 %v120_v10, %v129_v6  ;;  %v2077_v26 = vld [vmem:[#allocation7 + $0x1a0] ss:$8 sps:$4 sm:$0xff]   ;;  %v144_v57 = vld [vmem:[#allocation5 + $0x30] sm:$0xff] }
  0x4f   :  { %723 = vmatpush1.bf16.msra.mxu1 %v2035_v27  ;;  %511 = vmatprep.subr.bf16.mxu0 %v2036_v28  ;;  %v145_v13 = vld [vmem:[#allocation5 + $0x38] sm:$0xff]  ;;  %v2415_v27 = vadd.f32 %v139_v11, %v131_v16  ;;  %v96_v28 = vmax.f32 %v79_v17, %v88_v22  ;;  %v2089_v11 = vld [vmem:[#allocation7 + $0x180] ss:$8 sps:$4 sm:$0xff]   ;;  %v2095_v22 = vld [vmem:[#allocation7 + $0x264] ss:$8 sps:$4 sm:$0xff]  }
  0x50   :  { %724 = vmatprep.subr.bf16.mxu1 %v2038_v29  ;;  %v98_v29 = vmax.f32 %v81_v18, %v90_v23  ;;  %v2082_v58 = vld [vmem:[#allocation7 + $0x90] ss:$8 sps:$4 sm:$0xff]   ;;  %v2092_v17 = vld [vmem:[#allocation7 + $0x274] ss:$8 sps:$4 sm:$0xff]   ;;  %v2491_v23 = vadd.s32 16, %v2407_v45  ;;  %vm1863_vm10 = vmpackc.low %vm2518_vm8, %vm2512_vm7 }
  0x51   :  { %v2083_v61 = vld [vmem:[#allocation7 + $0x190] ss:$8 sps:$4 sm:$0xff]   ;;  %v2107_v56 = vld [vmem:[#allocation7 + $0x224] ss:$8 sps:$4 sm:$0xff]  }
  0x52   :  { %512 = vmatpush1.bf16.msra.mxu0 %v2040_v30  ;;  %v102_v30 = vmax.f32 %v85_v19, %v94_v24  ;;  %v2494_v24 = vadd.s32 24, %v2407_v45 }
  0x53   :  { %725 = vmatpush1.bf16.msra.mxu1 %v2041_v31  ;;  %513 = vmatprep.subr.bf16.mxu0 %v2042_v32  ;;  %v105_v31 = vld [vmem:[#allocation2 + $0x80] sm:$0xff]  ;;  %v107_v32 = vld [vmem:[#allocation2 + $0x90] sm:$0xff] }
  0x54   :  { %726 = vmatprep.subr.bf16.mxu1 %v2044_v33  ;;  %v111_v33 = vld [vmem:[#allocation2 + $0xb0] sm:$0xff] }
  0x56   :  { %514 = vmatpush2.bf16.msra.mxu0 %v2046_v34  ;;  %v2417_v34 = vadd.f32 %v141_v12, %v133_v20 }
  0x57   :  { %727 = vmatpush2.bf16.msra.mxu1 %v2047_v35  ;;  %515 = vmatprep.subr.bf16.mxu0 %v2048_v36  ;;  %v2419_v35 = vadd.f32 %v145_v13, %v137_v21  ;;  %v2090_v21 = vld [vmem:[#allocation7 + $0x270] ss:$8 sps:$4 sm:$0xff]   ;;  %v2101_v36 = vld [vmem:[#allocation7 + $0x244] ss:$8 sps:$4 sm:$0xff]  }
  0x58   :  { %728 = vmatprep.subr.bf16.mxu1 %v2050_v37  ;;  %v243_v14 = vrot.slane %v2417_v34, 1 }
  0x59   :  { %v218_v50 = vrot.slane %v2419_v35, 7 }
  0x5a   :  { %516 = vmatpush2.bf16.msra.mxu0 %v2052_v38  ;;  %v122_v38 = vld [vmem:[#allocation2 + $0xc0] sm:$0xff] }
  0x5b   :  { %729 = vmatpush2.bf16.msra.mxu1 %v2053_v40  ;;  %517 = vmatprep.subr.bf16.mxu0 %v2054_v41  ;;  %v128_v40 = vld [vmem:[#allocation2 + $0xf0] sm:$0xff] }
  0x5c   :  { %730 = vmatprep.subr.bf16.mxu1 %v2056_v42  ;;  %v2078_v41 = vld [vmem:[#allocation7 + $0x94] ss:$8 sps:$4 sm:$0xff]  }
  0x5d   :  { %v2080_v42 = vld [vmem:[#allocation7 + $0x194] ss:$8 sps:$4 sm:$0xff]  }
  0x5e   :  { %518 = vmatpush2.bf16.msra.mxu0 %v2058_v43  ;;  %v212_v43 = vrot.slane %v2415_v27, 7 }
  0x5f   :  { %731 = vmatpush2.bf16.msra.mxu1 %v2059_v44  ;;  %519 = vmatprep.subr.bf16.mxu0 %v2060_v46  ;;  %v113_v44 = vmax.f32 %v96_v28, %v105_v31  ;;  %v115_v46 = vmax.f32 %v98_v29, %v107_v32  ;;  %v84_v28 = vld [vmem:[#allocation2 + $0x28] sm:$0xff]  ;;  %v177_v31 = vand.u32 7, %v2491_v23  ;;  %v184_v32 = vand.u32 7, %v2494_v24 }
  0x60   :  { %732 = vmatprep.subr.bf16.mxu1 %v2062_v47  ;;  %v119_v47 = vmax.f32 %v102_v30, %v111_v33  ;;  %v227_v60 = vsel %vm219_vm0, %v218_v50, %v212_v43  ;;  %v93_v29 = vld [vmem:[#allocation2 + $0x68] sm:$0xff]  ;;  %v2096_v33 = vld [vmem:[#allocation7 + $0x250] ss:$8 sps:$4 sm:$0xff]  }
  0x61   :  { %v130_v53 = vmax.f32 %v113_v44, %v122_v38  ;;  %v132_v54 = vmax.f32 %v115_v46, %v124_v39  ;;  %v110_v30 = vld [vmem:[#allocation2 + $0xa8] sm:$0xff]  ;;  %v101_v37 = vmax.f32 %v84_v28, %v93_v29  ;;  %v83_v38 = vld [vmem:[#allocation2 + $0x20] sm:$0xff]  ;;  %vm2500_vm5 = vcmp.ne.s32.totalorder %v184_v32, 0 }
  0x62   :  { %520 = vmatpush2.bf16.msra.mxu0 %v2064_v48  ;;  %v138_v48 = vld [vmem:[#allocation5] sm:$0xff]  ;;  %v136_v55 = vmax.f32 %v119_v47, %v128_v40  ;;  %v127_v39 = vld [vmem:[#allocation2 + $0xe8] sm:$0xff]  ;;  %vm2506_vm6 = vcmp.ne.s32.totalorder %v177_v31, 0  ;;  %vm1951_vm11 = vcmp.ne.s32.totalorder %v184_v32, 7  ;;  %vm1952_vm12 = vcmp.ne.s32.totalorder %v177_v31, 7 }
  0x63   :  { %733 = vmatpush2.bf16.msra.mxu1 %v2065_v49  ;;  %521 = vmatprep.subr.bf16.mxu0 %v2066_v51  ;;  %v214_v49 = vrot.slane %v2417_v34, 7  ;;  %v266_v51 = vpack.c.bf16 %v2417_v34, %v2415_v27  ;;  %v146_v0 = vadd.f32 %v138_v48, %v130_v53  ;;  %v92_v40 = vld [vmem:[#allocation2 + $0x60] sm:$0xff]  ;;  %v143_v44 = vld [vmem:[#allocation5 + $0x28] sm:$0xff]  ;;  %v2104_v53 = vld [vmem:[#allocation7 + $0x234] ss:$8 sps:$4 sm:$0xff]  }
  0x64   :  { %734 = vmatprep.subr.bf16.mxu1 %v2068_v52  ;;  %v140_v52 = vld [vmem:[#allocation5 + $0x10] sm:$0xff]  ;;  %v126_v48 = vld [vmem:[#allocation2 + $0xe0] sm:$0xff]  ;;  %vm1789_vm9 = vmpackc.low %vm2500_vm5, %vm2506_vm6 }
  0x65   :  { %v225_v59 = vsel %vm219_vm0, %v212_v43, %v214_v49  ;;  %742 = vmatprep.mubr.bf16.mxu1 %v266_v51  ;;  %v2450_v1 = vadd.f32 %v140_v52, %v132_v54  ;;  %v211_v4 = vrot.slane %v146_v0, 7  ;;  %v240_v6 = vrot.slane %v146_v0, 1  ;;  %v2099_v52 = vld [vmem:[#allocation7 + $0x240] ss:$8 sps:$4 sm:$0xff]   ;;  %v2119_v28 = vld [vmem:[#allocation7 + $0x2e4] ss:$8 sps:$4 sm:$0xff]   ;;  %vm1873_vm13 = vmpackc.low %vm1951_vm11, %vm1952_vm12 }
  0x66   :  { %522 = vmatpush2.bf16.msra.mxu0 %v2070_v2  ;;  %v1780_v63 = vpack.c.bf16 %v225_v59, %v227_v60  ;;  %v2086_v2 = vld [vmem:[#allocation7 + $0x184] ss:$8 sps:$4 sm:$0xff]   ;;  %v100_v43 = vmax.f32 %v83_v38, %v92_v40  ;;  %v241_v59 = vrot.slane %v2415_v27, 1  ;;  %v2102_v60 = vld [vmem:[#allocation7 + $0x230] ss:$8 sps:$4 sm:$0xff]  }
  0x67   :  { %735 = vmatpush2.bf16.msra.mxu1 %v2071_v3  ;;  %523 = vmatprep.subr.bf16.mxu0 %v2072_v7  ;;  %v2452_v3 = vadd.f32 %v144_v57, %v136_v55  ;;  %v213_v5 = vrot.slane %v2450_v1, 7  ;;  %v242_v7 = vrot.slane %v2450_v1, 1  ;;  %v265_v20 = vpack.c.bf16 %v2450_v1, %v146_v0  ;;  %v2117_v29 = vld [vmem:[#allocation7 + $0x2e0] ss:$8 sps:$4 sm:$0xff]   ;;  %v2126_v38 = vld [vmem:[#allocation7 + $0x2b0] ss:$8 sps:$4 sm:$0xff]  }
  0x68   :  { %736 = vmatprep.subr.bf16.mxu1 %v2074_v8  ;;  %1781 = vmatprep.mubr.msk.bf16.mxu0 %vm1779_vm3, %v1780_v63  ;;  %v2088_v8 = vld [vmem:[#allocation7 + $0x80] ss:$8 sps:$4 sm:$0xff]   ;;  %v2608_v24 = vld [vmem:[#allocation8 + $0xec] ss:$16 sps:$4 sm:$0xff]   ;;  %v2146_v32 = vld [vmem:[#allocation8 + $0xc4] ss:$16 sps:$4 sm:$0xff]  }
  0x69   :  { %v217_v9 = vrot.slane %v2452_v3, 7  ;;  %v246_v10 = vrot.slane %v2452_v3, 1  ;;  %v224_v12 = vsel %vm219_vm0, %v211_v4, %v213_v5  ;;  %v2472_v13 = vsel %vm248_vm4, %v240_v6, %v242_v7  ;;  %v2129_v40 = vld [vmem:[#allocation7 + $0x2a0] ss:$8 sps:$4 sm:$0xff]   ;;  %v2610_v23 = vld [vmem:[#allocation8 + $0xcc] ss:$16 sps:$4 sm:$0xff]  }
  0x6a   :  { %524 = vmatpush2.bf16.msra.mxu0 %v2076_v25  ;;  %v2093_v25 = vld [vmem:[#allocation7 + $0x260] ss:$8 sps:$4 sm:$0xff]  }
  0x6b   :  { %737 = vmatpush2.bf16.msra.mxu1 %v2077_v26  ;;  %525 = vmatprep.subr.bf16.mxu0 %v2078_v41  ;;  %v226_v16 = vsel %vm219_vm0, %v217_v9, %v211_v4  ;;  %v2482_v18 = vsel %vm248_vm4, %v246_v10, %v240_v6  ;;  %v2098_v26 = vld [vmem:[#allocation7 + $0x254] ss:$8 sps:$4 sm:$0xff]   ;;  %v109_v41 = vld [vmem:[#allocation2 + $0xa0] sm:$0xff]  ;;  %v254_v4 = vsel %vm248_vm4, %v241_v59, %v243_v14  ;;  %v2614_v51 = vld [vmem:[#allocation8 + $0xc8] ss:$16 sps:$4 sm:$0xff]  }
  0x6c   :  { %738 = vmatprep.subr.bf16.mxu1 %v2080_v42  ;;  %v1785_v19 = vpack.c.bf16 %v224_v12, %v226_v16  ;;  %v118_v42 = vmax.f32 %v101_v37, %v110_v30  ;;  %v117_v55 = vmax.f32 %v100_v43, %v109_v41  ;;  %v2105_v6 = vld [vmem:[#allocation7 + $0x220] ss:$8 sps:$4 sm:$0xff]   ;;  %v2120_v30 = vld [vmem:[#allocation7 + $0x2d0] ss:$8 sps:$4 sm:$0xff]   ;;  %v2128_v37 = vld [vmem:[#allocation7 + $0x2b4] ss:$8 sps:$4 sm:$0xff]  }
  0x6d   :  { %v2134_v41 = vld [vmem:[#allocation7 + $0x294] ss:$8 sps:$4 sm:$0xff]   ;;  %v2137_v43 = vld [vmem:[#allocation7 + $0x284] ss:$8 sps:$4 sm:$0xff]   ;;  %v2135_v46 = vld [vmem:[#allocation7 + $0x280] ss:$8 sps:$4 sm:$0xff]  }
  0x6e   :  { %526 = vmatpush2.bf16.msra.mxu0 %v2082_v58  ;;  %v135_v54 = vmax.f32 %v118_v42, %v127_v39  ;;  %v142_v58 = vld [vmem:[#allocation5 + $0x20] sm:$0xff]  ;;  %v2132_v42 = vld [vmem:[#allocation7 + $0x290] ss:$8 sps:$4 sm:$0xff]  }
  0x6f   :  { %739 = vmatpush2.bf16.msra.mxu1 %v2083_v61  ;;  %527 = vmatprep.subr.bf16.mxu0 %v2084_v62  ;;  %v134_v62 = vmax.f32 %v117_v55, %v126_v48  ;;  %v2131_v39 = vld [vmem:[#allocation7 + $0x2a4] ss:$8 sps:$4 sm:$0xff]   ;;  %v2138_v27 = vld [vmem:[#allocation8 + $0xe0] ss:$16 sps:$4 sm:$0xff]  }
  0x70   :  { %740 = vmatprep.subr.bf16.mxu1 %v2086_v2  ;;  %v2524_v61 = vadd.f32 %v143_v44, %v135_v54  ;;  %v247_v44 = vrot.slane %v2419_v35, 1  ;;  %v2144_v31 = vld [vmem:[#allocation8 + $0xc0] ss:$16 sps:$4 sm:$0xff]   ;;  %v2152_v54 = vld [vmem:[#allocation8 + $0xa4] ss:$16 sps:$4 sm:$0xff]  }
  0x71   :  { %v150_v0 = vadd.f32 %v142_v58, %v134_v62  ;;  %v2617_v55 = vld [vmem:[#allocation8 + $0xac] ss:$16 sps:$4 sm:$0xff]   ;;  %v2150_v57 = vld [vmem:[#allocation8 + $0xa0] ss:$16 sps:$4 sm:$0xff]   ;;  %v2620_v58 = vld [vmem:[#allocation8 + $0xa8] ss:$16 sps:$4 sm:$0xff]  }
  0x72   :  { %528 = vmatpush2.bf16.msra.mxu0 %v2088_v8  ;;  %v216_v15 = vrot.slane %v2524_v61, 7  ;;  %v268_v63 = vpack.c.bf16 %v2419_v35, %v2524_v61  ;;  %v245_v2 = vrot.slane %v2524_v61, 1  ;;  %v256_v48 = vsel %vm248_vm4, %v247_v44, %v241_v59  ;;  %v2158_v59 = vld [vmem:[#allocation8 + $0x84] ss:$16 sps:$4 sm:$0xff]   ;;  %v2626_v61 = vld [vmem:[#allocation8 + $0x88] ss:$16 sps:$4 sm:$0xff]  }
  0x73   :  { %741 = vmatpush2.bf16.msra.mxu1 %v2089_v11  ;;  %959 = vmatprep.subr.bf16.mxu0 %v2092_v17  ;;  %v215_v12 = vrot.slane %v150_v0, 7  ;;  %v244_v16 = vrot.slane %v150_v0, 1  ;;  %v2110_v17 = vld [vmem:[#allocation7 + $0x214] ss:$8 sps:$4 sm:$0xff]  }
  0x74   :  { %v221_v8 = vsel %vm219_vm0, %v216_v15, %v218_v50  ;;  %v223_v11 = vsel %vm219_vm0, %v214_v49, %v216_v15  ;;  %v250_v47 = vsel %vm248_vm4, %v245_v2, %v247_v44  ;;  %v2164_v62 = vld [vmem:[#allocation8 + $0x64] ss:$16 sps:$4 sm:$0xff]   ;;  %v2162_v15 = vld [vmem:[#allocation8 + $0x60] ss:$16 sps:$4 sm:$0xff]   ;;  %v2690_v44 = vld [vmem:[#allocation8 + $0x12c] ss:$16 sps:$4 sm:$0xff]  }
  0x75   :  { %1786 = vmatmul.mubr.msk.bf16.vlgmr.msra.gmra.mxu0 %vm1779_vm3, %v1785_v19  ;;  %v1790_v19 = vpack.c.bf16 %v221_v8, %v223_v11  ;;  %v220_v34 = vsel %vm219_vm0, %v215_v12, %v217_v9  ;;  %v222_v49 = vsel %vm219_vm0, %v213_v5, %v215_v12  ;;  %v249_v1 = vsel %vm248_vm4, %v244_v16, %v246_v10  ;;  %v2113_v5 = vld [vmem:[#allocation7 + $0x204] ss:$8 sps:$4 sm:$0xff]   ;;  %v2114_v10 = vld [vmem:[#allocation7 + $0x2f0] ss:$8 sps:$4 sm:$0xff]  }
  0x76   :  { %743 = vmatmul.mubr.bf16.vlgmr.msra.gmra.mxu1 %v265_v20  ;;  %960 = vmatpush1.bf16.msra.mxu0 %v2090_v21  ;;  %v267_v20 = vpack.c.bf16 %v2452_v3, %v150_v0  ;;  %v252_v21 = vsel %vm248_vm4, %v243_v14, %v245_v2  ;;  %v2111_v3 = vld [vmem:[#allocation7 + $0x200] ss:$8 sps:$4 sm:$0xff]   ;;  %v1874_v35 = vpack.c.bf16 %v256_v48, %v250_v47  ;;  %v2623_v14 = vld [vmem:[#allocation8 + $0x8c] ss:$16 sps:$4 sm:$0xff]   ;;  %v2170_v0 = vld [vmem:[#allocation8 + $0x44] ss:$16 sps:$4 sm:$0xff]  }
  0x77   :  { %961 = vmatprep.subr.bf16.mxu0 %v2095_v22  ;;  %752 = vmatprep.mubr.bf16.mxu1 %v268_v63  ;;  %v1864_v50 = vpack.c.bf16 %v252_v21, %v254_v4  ;;  %v251_v22 = vsel %vm248_vm4, %v242_v7, %v244_v16  ;;  %v1879_v7 = vpack.c.bf16 %v2482_v18, %v249_v1  ;;  %v2122_v18 = vld [vmem:[#allocation7 + $0x2d4] ss:$8 sps:$4 sm:$0xff]   ;;  %v2632_v63 = vld [vmem:[#allocation8 + $0x68] ss:$16 sps:$4 sm:$0xff]   ;;  %v2168_v4 = vld [vmem:[#allocation8 + $0x40] ss:$16 sps:$4 sm:$0xff]  }
  0x78   :  { %1791 = vmatprep.mubr.msk.bf16.mxu0 %vm1789_vm9, %v1790_v19  ;;  %v1869_v9 = vpack.c.bf16 %v251_v22, %v2472_v13  ;;  %v2116_v13 = vld [vmem:[#allocation7 + $0x2f4] ss:$8 sps:$4 sm:$0xff]   ;;  %v2174_v12 = vld [vmem:[#allocation8 + $0x20] ss:$16 sps:$4 sm:$0xff]   ;;  %v2644_v16 = vld [vmem:[#allocation8 + $0x28] ss:$16 sps:$4 sm:$0xff]  }
  0x79   :  { %v2635_v2 = vld [vmem:[#allocation8 + $0x4c] ss:$16 sps:$4 sm:$0xff]   ;;  %v2176_v8 = vld [vmem:[#allocation8 + $0x24] ss:$16 sps:$4 sm:$0xff]   ;;  %v2650_v21 = vld [vmem:[#allocation8 + $0x8] ss:$16 sps:$4 sm:$0xff]  }
  0x7a   :  { %962 = vmatpush1.bf16.msra.mxu0 %v2093_v25  ;;  %v1795_v25 = vpack.c.bf16 %v220_v34, %v222_v49  ;;  %v2641_v11 = vld [vmem:[#allocation8 + $0x2c] ss:$16 sps:$4 sm:$0xff]   ;;  %v2188_v34 = vld [vmem:[#allocation8 + $0x1e4] ss:$16 sps:$4 sm:$0xff]   ;;  %v2656_v22 = vld [vmem:[#allocation8 + $0x1e8] ss:$16 sps:$4 sm:$0xff]  }
  0x7b   :  { %963 = vmatprep.subr.bf16.mxu0 %v2098_v26  ;;  %v2108_v26 = vld [vmem:[#allocation7 + $0x210] ss:$8 sps:$4 sm:$0xff]   ;;  %v2647_v19 = vld [vmem:[#allocation8 + $0xc] ss:$16 sps:$4 sm:$0xff]   ;;  %v2230_v47 = vld [vmem:[#allocation8 + $0x104] ss:$16 sps:$4 sm:$0xff]  }
  0x7c   :  { %v2653_v49 = vld [vmem:[#allocation8 + $0x1ec] ss:$16 sps:$4 sm:$0xff]   ;;  %v2662_v1 = vld [vmem:[#allocation8 + $0x1c8] ss:$16 sps:$4 sm:$0xff]   ;;  %v2228_v48 = vld [vmem:[#allocation8 + $0x100] ss:$16 sps:$4 sm:$0xff]  }
  0x7d   :  { %1796 = vmatmul.mubr.msk.bf16.gmra.mxu0 %vm1789_vm9, %v1795_v25  ;;  %v2194_v25 = vld [vmem:[#allocation8 + $0x1c4] ss:$16 sps:$4 sm:$0xff]   ;;  %vm1706_vm0 = vcmask 1042434   ;;  %vm1713_vm3 = vcmask 1047559  }
  0x7e   :  { %964 = vmatpush1.bf16.msra.mxu0 %v2096_v33  ;;  %753 = vmatmul.mubr.bf16.gmra.mxu1 %v267_v20  ;;  %v2125_v33 = vld [vmem:[#allocation7 + $0x2c4] ss:$8 sps:$4 sm:$0xff]   ;;  %v2180_v20 = vld [vmem:[#allocation8] ss:$16 sps:$4 sm:$0xff]  }
  0x7f   :  { %965 = vmatprep.subr.bf16.mxu0 %v2101_v36  ;;  %1865 = vmatprep.mubr.msk.bf16.mxu0 %vm1863_vm10, %v1864_v50  ;;  %v2123_v36 = vld [vmem:[#allocation7 + $0x2c0] ss:$8 sps:$4 sm:$0xff]  }
  0x80   :  { %v2186_v50 = vld [vmem:[#allocation8 + $0x1e0] ss:$16 sps:$4 sm:$0xff]  }
  0x82   :  { %966 = vmatpush1.bf16.msra.mxu0 %v2099_v52  ;;  %v2140_v52 = vld [vmem:[#allocation8 + $0xe4] ss:$16 sps:$4 sm:$0xff]  }
  0x83   :  { %967 = vmatprep.subr.bf16.mxu0 %v2104_v53  ;;  %v2606_v53 = vld [vmem:[#allocation8 + $0xe8] ss:$16 sps:$4 sm:$0xff]   ;;  %1458 = vmatprep.subr.bf16.mxu1 %v2140_v52 }
  0x84   :  { %1459 = vmatpush1.bf16.msra.mxu1 %v2138_v27  ;;  %v2698_v27 = vld [vmem:[#allocation8 + $0x108] ss:$16 sps:$4 sm:$0xff]  }
  0x85   :  { %1460 = vmatprep.subr.bf16.mxu1 %v2146_v32  ;;  %2798 = vst [vmem:[#allocation16_spill] sm:$0xff] %v2698_v27 }
  0x86   :  { %968 = vmatpush1.bf16.msra.mxu0 %v2102_v60  ;;  %v2156_v60 = vld [vmem:[#allocation8 + $0x80] ss:$16 sps:$4 sm:$0xff]  }
  0x87   :  { %969 = vmatprep.subr.bf16.mxu0 %v2107_v56  ;;  %v2629_v56 = vld [vmem:[#allocation8 + $0x6c] ss:$16 sps:$4 sm:$0xff]  }
  0x88   :  { %1461 = vmatpush1.bf16.msra.mxu1 %v2144_v31 }
  0x89   :  { %1462 = vmatprep.subr.bf16.mxu1 %v2152_v54 }
  0x8a   :  { %970 = vmatpush1.bf16.msra.mxu0 %v2105_v6  ;;  %v2638_v6 = vld [vmem:[#allocation8 + $0x48] ss:$16 sps:$4 sm:$0xff]  }
  0x8b   :  { %971 = vmatprep.subr.bf16.mxu0 %v2110_v17  ;;  %v2182_v17 = vld [vmem:[#allocation8 + $0x4] ss:$16 sps:$4 sm:$0xff]  }
  0x8c   :  { %1463 = vmatpush1.bf16.msra.mxu1 %v2150_v57 }
  0x8d   :  { %1464 = vmatprep.subr.bf16.mxu1 %v2158_v59 }
  0x8e   :  { %972 = vmatpush1.bf16.msra.mxu0 %v2108_v26  ;;  %v2192_v26 = vld [vmem:[#allocation8 + $0x1c0] ss:$16 sps:$4 sm:$0xff]  }
  0x8f   :  { %973 = vmatprep.subr.bf16.mxu0 %v2113_v5  ;;  %v2200_v5 = vld [vmem:[#allocation8 + $0x1a4] ss:$16 sps:$4 sm:$0xff]  }
  0x90   :  { %1465 = vmatpush1.bf16.msra.mxu1 %v2156_v60 }
  0x91   :  { %1466 = vmatprep.subr.bf16.mxu1 %v2164_v62 }
  0x92   :  { %974 = vmatpush1.bf16.msra.mxu0 %v2111_v3  ;;  %v2198_v3 = vld [vmem:[#allocation8 + $0x1a0] ss:$16 sps:$4 sm:$0xff]  }
  0x93   :  { %975 = vmatprep.subr.bf16.mxu0 %v2116_v13  ;;  %v2668_v13 = vld [vmem:[#allocation8 + $0x1a8] ss:$16 sps:$4 sm:$0xff]  }
  0x94   :  { %1467 = vmatpush1.bf16.msra.mxu1 %v2162_v15 }
  0x95   :  { %1468 = vmatprep.subr.bf16.mxu1 %v2170_v0 }
  0x96   :  { %976 = vmatpush2.bf16.msra.mxu0 %v2114_v10  ;;  %v2206_v10 = vld [vmem:[#allocation8 + $0x184] ss:$16 sps:$4 sm:$0xff]  }
  0x97   :  { %977 = vmatprep.subr.bf16.mxu0 %v2119_v28  ;;  %v2671_v28 = vld [vmem:[#allocation8 + $0x18c] ss:$16 sps:$4 sm:$0xff]  }
  0x98   :  { %1469 = vmatpush1.bf16.msra.mxu1 %v2168_v4 }
  0x99   :  { %1470 = vmatprep.subr.bf16.mxu1 %v2176_v8 }
  0x9a   :  { %978 = vmatpush2.bf16.msra.mxu0 %v2117_v29  ;;  %v2204_v29 = vld [vmem:[#allocation8 + $0x180] ss:$16 sps:$4 sm:$0xff]  }
  0x9b   :  { %979 = vmatprep.subr.bf16.mxu0 %v2122_v18  ;;  %v2674_v18 = vld [vmem:[#allocation8 + $0x188] ss:$16 sps:$4 sm:$0xff]  }
  0x9c   :  { %1471 = vmatpush1.bf16.msra.mxu1 %v2174_v12 }
  0x9d   :  { %1472 = vmatprep.subr.bf16.mxu1 %v2182_v17  ;;  %v2781_v17 = vsub.s32 1, %v2407_v45 }
  0x9e   :  { %980 = vmatpush2.bf16.msra.mxu0 %v2120_v30  ;;  %v2212_v30 = vld [vmem:[#allocation8 + $0x164] ss:$16 sps:$4 sm:$0xff]  }
  0x9f   :  { %981 = vmatprep.subr.bf16.mxu0 %v2125_v33  ;;  %v2210_v33 = vld [vmem:[#allocation8 + $0x160] ss:$16 sps:$4 sm:$0xff]  }
  0xa0   :  { %1473 = vmatpush1.bf16.msra.mxu1 %v2180_v20 }
  0xa1   :  { %1474 = vmatprep.subr.bf16.mxu1 %v2188_v34  ;;  %v2784_v34 = vsub.s32 0, %v2407_v45 }
  0xa2   :  { %982 = vmatpush2.bf16.msra.mxu0 %v2123_v36  ;;  %v2678_v36 = vld [vmem:[#allocation8 + $0x16c] ss:$16 sps:$4 sm:$0xff]  }
  0xa3   :  { %983 = vmatprep.subr.bf16.mxu0 %v2128_v37  ;;  %v2680_v37 = vld [vmem:[#allocation8 + $0x168] ss:$16 sps:$4 sm:$0xff]  }
  0xa4   :  { %1475 = vmatpush2.bf16.msra.mxu1 %v2186_v50 }
  0xa5   :  { %1476 = vmatprep.subr.bf16.mxu1 %v2194_v25 }
  0xa6   :  { %984 = vmatpush2.bf16.msra.mxu0 %v2126_v38  ;;  %v2218_v38 = vld [vmem:[#allocation8 + $0x144] ss:$16 sps:$4 sm:$0xff]  }
  0xa7   :  { %985 = vmatprep.subr.bf16.mxu0 %v2131_v39  ;;  %v2216_v39 = vld [vmem:[#allocation8 + $0x140] ss:$16 sps:$4 sm:$0xff]  }
  0xa8   :  { %1477 = vmatpush2.bf16.msra.mxu1 %v2192_v26 }
  0xa9   :  { %1478 = vmatprep.subr.bf16.mxu1 %v2200_v5 }
  0xaa   :  { %986 = vmatpush2.bf16.msra.mxu0 %v2129_v40  ;;  %v2684_v40 = vld [vmem:[#allocation8 + $0x14c] ss:$16 sps:$4 sm:$0xff]  }
  0xab   :  { %987 = vmatprep.subr.bf16.mxu0 %v2134_v41  ;;  %v2686_v41 = vld [vmem:[#allocation8 + $0x148] ss:$16 sps:$4 sm:$0xff]  }
  0xac   :  { %1479 = vmatpush2.bf16.msra.mxu1 %v2198_v3 }
  0xad   :  { %1480 = vmatprep.subr.bf16.mxu1 %v2206_v10 }
  0xae   :  { %988 = vmatpush2.bf16.msra.mxu0 %v2132_v42  ;;  %v2224_v42 = vld [vmem:[#allocation8 + $0x124] ss:$16 sps:$4 sm:$0xff]  }
  0xaf   :  { %989 = vmatprep.subr.bf16.mxu0 %v2137_v43  ;;  %v2222_v43 = vld [vmem:[#allocation8 + $0x120] ss:$16 sps:$4 sm:$0xff]  }
  0xb0   :  { %1481 = vmatpush2.bf16.msra.mxu1 %v2204_v29 }
  0xb1   :  { %1482 = vmatprep.subr.bf16.mxu1 %v2212_v30 }
  0xb2   :  { %990 = vmatpush2.bf16.msra.mxu0 %v2135_v46  ;;  %v2692_v46 = vld [vmem:[#allocation8 + $0x128] ss:$16 sps:$4 sm:$0xff]  }
  0xb3   :  { %1511 = vmatprep.subr.bf16.mxu0 %v2608_v24 }
  0xb4   :  { %1483 = vmatpush2.bf16.msra.mxu1 %v2210_v33 }
  0xb5   :  { %1870 = vmatmul.mubr.msk.bf16.vlgmr.msra.gmra.mxu0 %vm1863_vm10, %v1869_v9  ;;  %v2659_v9 = vld [vmem:[#allocation8 + $0x1cc] ss:$16 sps:$4 sm:$0xff]   ;;  %1484 = vmatprep.subr.bf16.mxu1 %v2218_v38 }
  0xb6   :  { %1875 = vmatprep.mubr.msk.bf16.mxu0 %vm1873_vm13, %v1874_v35  ;;  %1512 = vmatpush1.bf16.msra.mxu0 %v2606_v53  ;;  %v2696_v35 = vld [vmem:[#allocation8 + $0x10c] ss:$16 sps:$4 sm:$0xff]  }
  0xb7   :  { %1513 = vmatprep.subr.bf16.mxu0 %v2610_v23 }
  0xb8   :  { %1485 = vmatpush2.bf16.msra.mxu1 %v2216_v39 }
  0xb9   :  { %1486 = vmatprep.subr.bf16.mxu1 %v2224_v42 }
  0xba   :  { %1514 = vmatpush1.bf16.msra.mxu0 %v2614_v51 }
  0xbb   :  { %1515 = vmatprep.subr.bf16.mxu0 %v2617_v55 }
  0xbc   :  { %1487 = vmatpush2.bf16.msra.mxu1 %v2222_v43 }
  0xbd   :  { %1880 = vmatmul.mubr.msk.bf16.gmra.mxu0 %vm1873_vm13, %v1879_v7  ;;  %v2665_v7 = vld [vmem:[#allocation8 + $0x1ac] ss:$16 sps:$4 sm:$0xff]   ;;  %1488 = vmatprep.subr.bf16.mxu1 %v2230_v47 }
  0xbe   :  { %1516 = vmatpush1.bf16.msra.mxu0 %v2620_v58 }
  0xbf   :  { %1517 = vmatprep.subr.bf16.mxu0 %v2623_v14 }
  0xc0   :  { %1489 = vmatpush2.bf16.msra.mxu1 %v2228_v48 }
  0xc1   :  { %1953 = vmatprep.subr.bf16.mxu1 %v2608_v24  ;;  %v1020_v24 = vld [vmem:[%s2776_s3] sm:$0x3] }
  0xc2   :  { %1518 = vmatpush1.bf16.msra.mxu0 %v2626_v61  ;;  %v1029_v29 = vrot.slane %v1020_v24, %v2781_v17  ;;  %v1025_v33 = vrot.slane %v1020_v24, %v2784_v34 }
  0xc3   :  { %1519 = vmatprep.subr.bf16.mxu0 %v2629_v56 }
  0xc6   :  { %1520 = vmatpush1.bf16.msra.mxu0 %v2632_v63 }
  0xc7   :  { %1521 = vmatprep.subr.bf16.mxu0 %v2635_v2 }
  0xca   :  { %1522 = vmatpush1.bf16.msra.mxu0 %v2638_v6 }
  0xcb   :  { %1523 = vmatprep.subr.bf16.mxu0 %v2641_v11 }
  0xce   :  { %1524 = vmatpush1.bf16.msra.mxu0 %v2644_v16 }
  0xcf   :  { %1525 = vmatprep.subr.bf16.mxu0 %v2647_v19 }
  0xd2   :  { %1526 = vmatpush1.bf16.msra.mxu0 %v2650_v21 }
  0xd3   :  { %1527 = vmatprep.subr.bf16.mxu0 %v2653_v49 }
  0xd6   :  { %1528 = vmatpush2.bf16.msra.mxu0 %v2656_v22 }
  0xd7   :  { %1529 = vmatprep.subr.bf16.mxu0 %v2659_v9 }
  0xda   :  { %1530 = vmatpush2.bf16.msra.mxu0 %v2662_v1 }
  0xdb   :  { %1531 = vmatprep.subr.bf16.mxu0 %v2665_v7 }
  0xde   :  { %1532 = vmatpush2.bf16.msra.mxu0 %v2668_v13 }
  0xdf   :  { %1533 = vmatprep.subr.bf16.mxu0 %v2671_v28 }
  0xe2   :  { %1534 = vmatpush2.bf16.msra.mxu0 %v2674_v18 }
  0xe3   :  { %1535 = vmatprep.subr.bf16.mxu0 %v2678_v36 }
  0xe6   :  { %1536 = vmatpush2.bf16.msra.mxu0 %v2680_v37 }
  0xe7   :  { %1537 = vmatprep.subr.bf16.mxu0 %v2684_v40 }
  0xea   :  { %1538 = vmatpush2.bf16.msra.mxu0 %v2686_v41 }
  0xeb   :  { %1539 = vmatprep.subr.bf16.mxu0 %v2690_v44 }
  0xee   :  { %1540 = vmatpush2.bf16.msra.mxu0 %v2692_v46 }
  0xef   :  { %1541 = vmatprep.subr.bf16.mxu0 %v2696_v35 }
  0xf2   :  { %1542 = vmatpush2.bf16.msra.mxu0 %v2698_v27 }
 0x135   :  { %v531_v52 = vpop.f32.mrf.mxu0 }
 0x136   :  { %v744_v54 = vpop.f32.mrf.mxu1 }
 0x137   :  { %v533_v32 = vpop.f32.mrf.mxu0  ;;  %v745_v25 = vadd.f32 %v744_v54, %v531_v52 }
 0x138   :  { %v746_v60 = vpop.f32.mrf.mxu1 }
 0x139   :  { %v535_v31 = vpop.f32.mrf.mxu0  ;;  %v747_v50 = vadd.f32 %v746_v60, %v533_v32 }
 0x13a   :  { %v748_v15 = vpop.f32.mrf.mxu1 }
 0x13b   :  { %v537_v57 = vpop.f32.mrf.mxu0  ;;  %v749_v3 = vadd.f32 %v748_v15, %v535_v31 }
 0x13c   :  { %v750_v4 = vpop.f32.mrf.mxu1 }
 0x13d   :  { %v541_v59 = vpop.f32.mrf.mxu0  ;;  %v751_v39 = vadd.f32 %v750_v4, %v537_v57 }
 0x13e   :  { %v754_v8 = vpop.f32.mrf.mxu1 }
 0x13f   :  { %v543_v62 = vpop.f32.mrf.mxu0  ;;  %v755_v15 = vadd.f32 %v754_v8, %v541_v59 }
 0x140   :  { %v756_v26 = vpop.f32.mrf.mxu1 }
 0x141   :  { %v545_v0 = vpop.f32.mrf.mxu0  ;;  %v757_v27 = vadd.f32 %v756_v26, %v543_v62 }
 0x142   :  { %v758_v43 = vpop.f32.mrf.mxu1 }
 0x143   :  { %v547_v12 = vpop.f32.mrf.mxu0 }
 0x175   :  { %v993_v20 = vpop.f32.mrf.mxu0 }
 0x176   :  { %v1012_v30 = vadd.f32 %v993_v20, %v745_v25  ;;  %v759_v20 = vadd.f32 %v758_v43, %v545_v0 }
 0x177   :  { %v995_v5 = vpop.f32.mrf.mxu0 }
 0x178   :  { %v1013_v10 = vadd.f32 %v995_v5, %v747_v50  ;;  %v1032_v52 = vadd.f32 %v1025_v33, %v1012_v30  ;;  %v760_v50 = vpop.f32.mrf.mxu1 }
 0x179   :  { %v997_v38 = vpop.f32.mrf.mxu0 }
 0x17a   :  { %v1014_v42 = vadd.f32 %v997_v38, %v749_v3  ;;  %v1033_v48 = vadd.f32 %v1029_v29, %v1013_v10  ;;  %v1040_v34 = vmax.f32 %v1032_v52, 0.0  ;;  %v761_v3 = vadd.f32 %v760_v50, %v547_v12 }
 0x17b   :  { %v999_v47 = vpop.f32.mrf.mxu0 }
 0x17c   :  { %v1034_v32 = vadd.f32 %v1025_v33, %v1014_v42  ;;  %v1015_v60 = vadd.f32 %v999_v47, %v751_v39  ;;  %v1041_v25 = vmax.f32 %v1033_v48, 0.0 }
 0x17d   :  { %v1003_v54 = vpop.f32.mrf.mxu0 }
 0x17e   :  { %v1035_v31 = vadd.f32 %v1029_v29, %v1015_v60  ;;  %v1042_v5 = vmax.f32 %v1034_v32, 0.0  ;;  %v1016_v57 = vadd.f32 %v1003_v54, %v755_v15 }
 0x17f   :  { %v1005_v17 = vpop.f32.mrf.mxu0 }
 0x180   :  { %v1043_v45 = vmax.f32 %v1035_v31, 0.0  ;;  %v1017_v24 = vadd.f32 %v1005_v17, %v757_v27  ;;  %v1048_v42 = vpack.c.bf16 %v1042_v5, %v1040_v34  ;;  %v1036_v59 = vadd.f32 %v1025_v33, %v1016_v57 }
 0x181   :  { %v1007_v4 = vpop.f32.mrf.mxu0 }
 0x182   :  { %v1018_v38 = vadd.f32 %v1007_v4, %v759_v20  ;;  %v1049_v10 = vpack.c.bf16 %v1043_v45, %v1041_v25  ;;  %v1037_v30 = vadd.f32 %v1029_v29, %v1017_v24  ;;  %v1044_v17 = vmax.f32 %v1036_v59, 0.0 }
 0x183   :  { %v1009_v39 = vpop.f32.mrf.mxu0 }
 0x184   :  { %v1038_v47 = vadd.f32 %v1025_v33, %v1018_v38  ;;  %v1019_v62 = vadd.f32 %v1009_v39, %v761_v3  ;;  %1490 = vmatprep.mubr.bf16.mxu1 %v1049_v10  ;;  %1543 = vmatprep.mubr.bf16.mxu0 %v1049_v10  ;;  %v1045_v8 = vmax.f32 %v1037_v30, 0.0 }
 0x185   :  { %1491 = vmatmul.mubr.bf16.vlgmr.msra.gmra.mxu1 %v1048_v42  ;;  %1544 = vmatmul.mubr.bf16.vlgmr.msra.gmra.mxu0 %v1048_v42 }
 0x186   :  { %v1039_v0 = vadd.f32 %v1029_v29, %v1019_v62  ;;  %1969 = vmatpush1.bf16.msra.mxu1 %v2606_v53  ;;  %v1046_v27 = vmax.f32 %v1038_v47, 0.0  ;;  %v2799_v53 = vld [vmem:[#allocation16_spill] sm:$0xff] }
 0x187   :  { %1954 = vmatprep.subr.bf16.mxu1 %v2610_v23  ;;  %v2746_v23 = vld [vmem:[%s2778_s5] sm:$0xf]  ;;  %s2350_s5 = smov [#allocation10]  }
 0x188   :  { %v1047_v12 = vmax.f32 %v1039_v0, 0.0  ;;  %v1050_v34 = vpack.c.bf16 %v1046_v27, %v1044_v17  ;;  %s1734_s20 = sshll.u32 %s2350_s5, 4  ;;  %s1735_s20 = int_to_ptr.vmem [resolvable:$true] %s1734_s20 }
 0x189   :  { %s2314_s21 = scalar_lea.vmem %s1735_s20, 256  ;;  %p2319_p7 = scmp.lt.s32.totalorder %s1735_s20, %s1735_s20 }
 0x18a   :  { %1970 = vmatpush1.bf16.msra.mxu1 %v2614_v51  ;;  %v1051_v45 = vpack.c.bf16 %v1047_v12, %v1045_v8  ;;  %v2800_v51 = vld [vmem:[#allocation15_spill] sm:$0xff]  ;;  %p2315_p6 = scmp.ne.s32.totalorder %s1735_s20, %s2314_s21  ;;  %p2320_p8 = scmp.lt.s32.totalorder %s2314_s21, %s2314_s21 }
 0x18b   :  { %1955 = vmatprep.subr.bf16.mxu1 %v2617_v55  ;;  %v2801_v55 = vsub.s32 0, %v2800_v51 }
 0x18c   :  { %1500 = vmatprep.mubr.bf16.mxu1 %v1051_v45  ;;  %p2321_p9 = por %p2320_p8, %p2319_p7 }
 0x18d   :  { %1501 = vmatmul.mubr.bf16.gmra.mxu1 %v1050_v34 }
 0x18e   :  { %1971 = vmatpush1.bf16.msra.mxu1 %v2620_v58  ;;  %1553 = vmatprep.mubr.bf16.mxu1 %v1051_v45  ;;  %v1121_v58 = vrot.slane %v2746_v23, %v2801_v55  ;;  %p2322_p10 = pnand %p2321_p9, %p2315_p6 }
 0x18f   :  { %1956 = vmatprep.subr.bf16.mxu1 %v2623_v14  ;;  %v2802_v14 = vsub.s32 1, %v2800_v51 }
 0x192   :  { %1972 = vmatpush1.bf16.msra.mxu1 %v2626_v61  ;;  %v1125_v61 = vrot.slane %v2746_v23, %v2802_v14 }
 0x193   :  { %1957 = vmatprep.subr.bf16.mxu1 %v2629_v56 }
 0x196   :  { %1973 = vmatpush1.bf16.msra.mxu1 %v2632_v63 }
 0x197   :  { %1958 = vmatprep.subr.bf16.mxu1 %v2635_v2 }
 0x19a   :  { %1974 = vmatpush1.bf16.msra.mxu1 %v2638_v6 }
 0x19b   :  { %1959 = vmatprep.subr.bf16.mxu1 %v2641_v11 }
 0x19e   :  { %1975 = vmatpush1.bf16.msra.mxu1 %v2644_v16 }
 0x19f   :  { %1960 = vmatprep.subr.bf16.mxu1 %v2647_v19 }
 0x1a2   :  { %1976 = vmatpush1.bf16.msra.mxu1 %v2650_v21 }
 0x1a3   :  { %1961 = vmatprep.subr.bf16.mxu1 %v2653_v49 }
 0x1a6   :  { %1977 = vmatpush2.bf16.msra.mxu1 %v2656_v22 }
 0x1a7   :  { %1962 = vmatprep.subr.bf16.mxu1 %v2659_v9 }
 0x1aa   :  { %1978 = vmatpush2.bf16.msra.mxu1 %v2662_v1 }
 0x1ab   :  { %1963 = vmatprep.subr.bf16.mxu1 %v2665_v7 }
 0x1ae   :  { %1979 = vmatpush2.bf16.msra.mxu1 %v2668_v13 }
 0x1af   :  { %1964 = vmatprep.subr.bf16.mxu1 %v2671_v28 }
 0x1b2   :  { %1980 = vmatpush2.bf16.msra.mxu1 %v2674_v18 }
 0x1b3   :  { %1965 = vmatprep.subr.bf16.mxu1 %v2678_v36 }
 0x1b6   :  { %1981 = vmatpush2.bf16.msra.mxu1 %v2680_v37 }
 0x1b7   :  { %1966 = vmatprep.subr.bf16.mxu1 %v2684_v40 }
 0x1ba   :  { %1982 = vmatpush2.bf16.msra.mxu1 %v2686_v41 }
 0x1bb   :  { %1967 = vmatprep.subr.bf16.mxu1 %v2690_v44 }
 0x1be   :  { %1983 = vmatpush2.bf16.msra.mxu1 %v2692_v46 }
 0x1bf   :  { %1968 = vmatprep.subr.bf16.mxu1 %v2696_v35 }
 0x1c2   :  { %1984 = vmatpush2.bf16.msra.mxu1 %v2799_v53 }
 0x1c5   :  { %1554 = vmatmul.mubr.bf16.vlgmr.msra.gmra.mxu1 %v1050_v34 }
 0x245   :  { %v1492_v56 = vpop.f32.mrf.mxu1  ;;  %v1545_v34 = vpop.f32.mrf.mxu0 }
 0x246   :  { %v1493_v63 = vadd.f32 %v1492_v56, %v1121_v58 }
 0x247   :  { %v1494_v2 = vpop.f32.mrf.mxu1 }
 0x248   :  { %v1495_v6 = vadd.f32 %v1494_v2, %v1125_v61  ;;  %v1564_v11 = vmax.f32 %v1493_v63, 0.0 }
 0x249   :  { %v1496_v16 = vpop.f32.mrf.mxu1 }
 0x24a   :  { %v1565_v19 = vmax.f32 %v1495_v6, 0.0  ;;  %v1497_v21 = vadd.f32 %v1496_v16, %v1121_v58  ;;  %v1580_v9 = vrot.slane %v1564_v11, 4 }
 0x24b   :  { %v1498_v49 = vpop.f32.mrf.mxu1 }
 0x24c   :  { %v1586_v22 = vrot.slane %v1565_v19, 4  ;;  %v1568_v1 = vmax.f32 %v1497_v21, 0.0  ;;  %v1499_v7 = vadd.f32 %v1498_v49, %v1125_v61  ;;  %v1581_v40 = vmax.f32 %v1564_v11, %v1580_v9 }
 0x24d   :  { %v1502_v13 = vpop.f32.mrf.mxu1 }
 0x24e   :  { %v1587_v28 = vmax.f32 %v1565_v19, %v1586_v22  ;;  %v1604_v18 = vrot.slane %v1568_v1, 4  ;;  %v1569_v36 = vmax.f32 %v1499_v7, 0.0  ;;  %v1582_v33 = vrot.slane %v1581_v40, 2  ;;  %v1547_v19 = vpop.f32.mrf.mxu0 }
 0x24f   :  { %v1504_v37 = vpop.f32.mrf.mxu1  ;;  %v1503_v32 = vadd.f32 %v1502_v13, %v1121_v58 }
 0x250   :  { %v1605_v41 = vmax.f32 %v1568_v1, %v1604_v18  ;;  %v1610_v44 = vrot.slane %v1569_v36, 4  ;;  %v1588_v46 = vrot.slane %v1587_v28, 2  ;;  %v1505_v60 = vadd.f32 %v1504_v37, %v1125_v61  ;;  %v1549_v18 = vpop.f32.mrf.mxu0 }
 0x251   :  { %v1506_v29 = vpop.f32.mrf.mxu1  ;;  %v1572_v50 = vmax.f32 %v1503_v32, 0.0  ;;  %v1583_v20 = vmax.f32 %v1581_v40, %v1582_v33 }
 0x252   :  { %v1606_v35 = vrot.slane %v1605_v41, 2  ;;  %v1611_v26 = vmax.f32 %v1569_v36, %v1610_v44  ;;  %v1589_v52 = vmax.f32 %v1587_v28, %v1588_v46  ;;  %v1573_v5 = vmax.f32 %v1505_v60, 0.0 }
 0x253   :  { %v1508_v15 = vpop.f32.mrf.mxu1  ;;  %v1628_v24 = vrot.slane %v1572_v50, 4  ;;  %v1507_v4 = vadd.f32 %v1506_v29, %v1121_v58  ;;  %v1584_v59 = vrot.slane %v1583_v20, 1  ;;  %v1551_v29 = vpop.f32.mrf.mxu0 }
 0x254   :  { %v1607_v43 = vmax.f32 %v1605_v41, %v1606_v35  ;;  %v1612_v48 = vrot.slane %v1611_v26, 2  ;;  %v1634_v57 = vrot.slane %v1573_v5, 4  ;;  %v1509_v3 = vadd.f32 %v1508_v15, %v1125_v61 }
 0x255   :  { %v1590_v38 = vrot.slane %v1589_v52, 1  ;;  %v1629_v39 = vmax.f32 %v1572_v50, %v1628_v24  ;;  %v1576_v47 = vmax.f32 %v1507_v4, 0.0  ;;  %v1585_v61 = vmax.f32 %v1583_v20, %v1584_v59 }
 0x256   :  { %v1608_v54 = vrot.slane %v1607_v43, 1  ;;  %v1613_v31 = vmax.f32 %v1611_v26, %v1612_v48  ;;  %v1635_v30 = vmax.f32 %v1573_v5, %v1634_v57  ;;  %v1577_v62 = vmax.f32 %v1509_v3, 0.0 }
 0x257   :  { %v1630_v27 = vrot.slane %v1629_v39, 2  ;;  %v1652_v12 = vrot.slane %v1576_v47, 4  ;;  %v1591_v45 = vmax.f32 %v1589_v52, %v1590_v38  ;;  %v1132_v41 = vsub.s32 3, %v2800_v51 }
 0x258   :  { %v1614_v25 = vrot.slane %v1613_v31, 1  ;;  %v1609_v10 = vmax.f32 %v1607_v43, %v1608_v54  ;;  %v1636_v8 = vrot.slane %v1635_v30, 2  ;;  %v1658_v17 = vrot.slane %v1577_v62, 4 }
 0x259   :  { %v1631_v53 = vmax.f32 %v1629_v39, %v1630_v27  ;;  %v1653_v14 = vmax.f32 %v1576_v47, %v1652_v12  ;;  %v1692_v16 = vcombine.low %v1585_v61, %v1591_v45  ;;  %v1128_v26 = vsub.s32 2, %v2800_v51 }
 0x25a   :  { %v1615_v42 = vmax.f32 %v1613_v31, %v1614_v25  ;;  %v1637_v55 = vmax.f32 %v1635_v30, %v1636_v8  ;;  %v1659_v58 = vmax.f32 %v1577_v62, %v1658_v17  ;;  %v1133_v43 = vrot.slane %v2746_v23, %v1132_v41 }
 0x25b   :  { %v1632_v63 = vrot.slane %v1631_v53, 1  ;;  %v1654_v6 = vrot.slane %v1653_v14, 2  ;;  %v1129_v60 = vrot.slane %v2746_v23, %v1128_v26 }
 0x25c   :  { %v1694_v0 = vcombine.low %v1609_v10, %v1615_v42  ;;  %v1638_v2 = vrot.slane %v1637_v55, 1  ;;  %v1660_v11 = vrot.slane %v1659_v58, 2  ;;  %v1552_v52 = vadd.f32 %v1551_v29, %v1133_v43 }
 0x25d   :  { %v1633_v21 = vmax.f32 %v1631_v53, %v1632_v63  ;;  %v1655_v22 = vmax.f32 %v1653_v14, %v1654_v6  ;;  %v1550_v31 = vadd.f32 %v1549_v18, %v1129_v60  ;;  %v1548_v50 = vadd.f32 %v1547_v19, %v1133_v43 }
 0x25e   :  { %v1700_v56 = vrot.slane %v1694_v0, 7  ;;  %v1639_v49 = vmax.f32 %v1637_v55, %v1638_v2  ;;  %v1661_v9 = vmax.f32 %v1659_v58, %v1660_v11  ;;  %v1571_v15 = vmax.f32 %v1552_v52, 0.0 }
 0x25f   :  { %v1656_v13 = vrot.slane %v1655_v22, 1  ;;  %v1570_v51 = vmax.f32 %v1550_v31, 0.0  ;;  %v1546_v5 = vadd.f32 %v1545_v34, %v1129_v60  ;;  %v1567_v25 = vmax.f32 %v1548_v50, 0.0 }
 0x260   :  { %v1702_v1 = vsel %vm1701_vm14, %v1700_v56, %v1692_v16  ;;  %v1696_v7 = vcombine.low %v1633_v21, %v1639_v49  ;;  %v1662_v28 = vrot.slane %v1661_v9, 1  ;;  %v1622_v20 = vrot.slane %v1571_v15, 4 }
 0x261   :  { %v1657_v37 = vmax.f32 %v1655_v22, %v1656_v13  ;;  %v1704_v44 = vsel %vm1703_vm15, %v1700_v56, %v1702_v1  ;;  %v1616_v24 = vrot.slane %v1570_v51, 4  ;;  %v1566_v57 = vmax.f32 %v1546_v5, 0.0 }
 0x262   :  { %v1705_v36 = vrot.slane %v1696_v7, 6  ;;  %v1663_v40 = vmax.f32 %v1661_v9, %v1662_v28  ;;  %v1623_v4 = vmax.f32 %v1571_v15, %v1622_v20  ;;  %v1598_v3 = vrot.slane %v1567_v25, 4 }
 0x263   :  { %v1617_v38 = vmax.f32 %v1570_v51, %v1616_v24  ;;  %v1592_v10 = vrot.slane %v1566_v57, 4 }
 0x264   :  { %v1698_v46 = vcombine.low %v1657_v37, %v1663_v40  ;;  %v1707_v35 = vsel %vm1706_vm0, %v1705_v36, %v1704_v44  ;;  %v1624_v42 = vrot.slane %v1623_v4, 2  ;;  %v1599_v39 = vmax.f32 %v1567_v25, %v1598_v3 }
 0x265   :  { %v1709_v48 = vsel %vm1708_vm1, %v1705_v36, %v1707_v35  ;;  %v1618_v23 = vrot.slane %v1617_v38, 2  ;;  %v1593_v30 = vmax.f32 %v1566_v57, %v1592_v10 }
 0x266   :  { %v1710_v33 = vrot.slane %v1698_v46, 5  ;;  %v1625_v47 = vmax.f32 %v1623_v4, %v1624_v42  ;;  %v1600_v62 = vrot.slane %v1599_v39, 2 }
 0x267   :  { %v1619_v59 = vmax.f32 %v1617_v38, %v1618_v23  ;;  %v1594_v8 = vrot.slane %v1593_v30, 2 }
 0x268   :  { %v1712_v32 = vsel %vm1711_vm2, %v1710_v33, %v1709_v48  ;;  %v1626_v12 = vrot.slane %v1625_v47, 1  ;;  %v1601_v53 = vmax.f32 %v1599_v39, %v1600_v62 }
 0x269   :  { %v1714_v54 = vsel %vm1713_vm3, %v1710_v33, %v1712_v32  ;;  %v1620_v55 = vrot.slane %v1619_v59, 1  ;;  %v1595_v63 = vmax.f32 %v1593_v30, %v1594_v8 }
 0x26a   :  { %1726 = vst [vmem:[#allocation10] sm:$0xff] %v1714_v54  ;;  %v1627_v2 = vmax.f32 %v1625_v47, %v1626_v12  ;;  %v1602_v49 = vrot.slane %v1601_v53, 1 }
 0x26b   :  { %v1621_v22 = vmax.f32 %v1619_v59, %v1620_v55  ;;  %v1596_v28 = vrot.slane %v1595_v63, 1 }
 0x26c   :  { %v1603_v44 = vmax.f32 %v1601_v53, %v1602_v49 }
 0x26d   :  { %v1695_v18 = vcombine.low %v1621_v22, %v1627_v2  ;;  %v1597_v33 = vmax.f32 %v1595_v63, %v1596_v28 }
 0x26f   :  { %v1715_v48 = vrot.slane %v1695_v18, 7  ;;  %v1693_v52 = vcombine.low %v1597_v33, %v1603_v44 }
 0x271   :  { %v1716_v51 = vsel %vm1701_vm14, %v1715_v48, %v1693_v52 }
 0x272   :  { %v1717_v4 = vsel %vm1703_vm15, %v1715_v48, %v1716_v51 }
 0x285   :  { %v1555_v0 = vpop.f32.mrf.mxu1 }
 0x286   :  { %v1556_v27 = vadd.f32 %v1555_v0, %v1129_v60 }
 0x287   :  { %v1557_v17 = vpop.f32.mrf.mxu1 }
 0x288   :  { %v1574_v45 = vmax.f32 %v1556_v27, 0.0  ;;  %v1558_v34 = vadd.f32 %v1557_v17, %v1133_v43 }
 0x289   :  { %v1559_v14 = vpop.f32.mrf.mxu1 }
 0x28a   :  { %v1640_v58 = vrot.slane %v1574_v45, 4  ;;  %v1575_v61 = vmax.f32 %v1558_v34, 0.0  ;;  %v1560_v56 = vadd.f32 %v1559_v14, %v1129_v60 }
 0x28b   :  { %v1561_v6 = vpop.f32.mrf.mxu1 }
 0x28c   :  { %v1641_v11 = vmax.f32 %v1574_v45, %v1640_v58  ;;  %v1646_v16 = vrot.slane %v1575_v61, 4  ;;  %v1578_v19 = vmax.f32 %v1560_v56, 0.0  ;;  %v1562_v21 = vadd.f32 %v1561_v6, %v1133_v43 }
 0x28e   :  { %v1642_v9 = vrot.slane %v1641_v11, 2  ;;  %v1647_v1 = vmax.f32 %v1575_v61, %v1646_v16  ;;  %v1664_v7 = vrot.slane %v1578_v19, 4  ;;  %v1579_v13 = vmax.f32 %v1562_v21, 0.0 }
 0x290   :  { %v1643_v36 = vmax.f32 %v1641_v11, %v1642_v9  ;;  %v1648_v37 = vrot.slane %v1647_v1, 2  ;;  %v1665_v40 = vmax.f32 %v1578_v19, %v1664_v7  ;;  %v1670_v41 = vrot.slane %v1579_v13, 4 }
 0x292   :  { %v1644_v46 = vrot.slane %v1643_v36, 1  ;;  %v1649_v35 = vmax.f32 %v1647_v1, %v1648_v37  ;;  %v1666_v26 = vrot.slane %v1665_v40, 2  ;;  %v1671_v29 = vmax.f32 %v1579_v13, %v1670_v41 }
 0x294   :  { %v1650_v43 = vrot.slane %v1649_v35, 1  ;;  %v1667_v32 = vmax.f32 %v1665_v40, %v1666_v26  ;;  %v1672_v60 = vrot.slane %v1671_v29, 2  ;;  %v1645_v54 = vmax.f32 %v1643_v36, %v1644_v46 }
 0x296   :  { %v1651_v31 = vmax.f32 %v1649_v35, %v1650_v43  ;;  %v1668_v15 = vrot.slane %v1667_v32, 1  ;;  %v1673_v50 = vmax.f32 %v1671_v29, %v1672_v60 }
 0x298   :  { %v1697_v5 = vcombine.low %v1645_v54, %v1651_v31  ;;  %v1674_v20 = vrot.slane %v1673_v50, 1  ;;  %v1669_v24 = vmax.f32 %v1667_v32, %v1668_v15 }
 0x29a   :  { %v1718_v25 = vrot.slane %v1697_v5, 6  ;;  %v1675_v57 = vmax.f32 %v1673_v50, %v1674_v20 }
 0x29c   :  { %v1699_v3 = vcombine.low %v1669_v24, %v1675_v57  ;;  %v1719_v38 = vsel %vm1706_vm0, %v1718_v25, %v1717_v4 }
 0x29d   :  { %v1720_v42 = vsel %vm1708_vm1, %v1718_v25, %v1719_v38 }
 0x29e   :  { %v1721_v10 = vrot.slane %v1699_v3, 5 }
 0x2a0   :  { %v1722_v39 = vsel %vm1711_vm2, %v1721_v10, %v1720_v42 }
 0x2a1   :  { %v1723_v23 = vsel %vm1713_vm3, %v1721_v10, %v1722_v39 }
 0x2a2   :  { %1727 = vst [vmem:[#allocation10 + $0x8] sm:$0xff] %v1723_v23 }
 0x2a3   :  { %2325 = shalt.err (!%p2322_p10)
}
 0x2a4   :  { %1737 = dma.vmem_to_hbm [thread:$0]  %s1735_s20, 256, %s2779_s6, [#allocation4]  }
 0x2a5   :  { %2340 = dma.done.wait [#allocation4], 256  }
 0x2a6   :  { %2341 = vsyncadd [#allocation4], 4294967040 }
 0x2a7   :  { %1741 = vsyncpa [#allocation3], 1 }
 0x2a8   :  { %1742 = vsyncpa [#allocation6], 1 }
 0x2a9   :  { %1743 = vsyncpa [#allocation9], 1 }
 0x2aa   :  { %1744 = vsyncpa [#allocation4], 1 }

</bundles_post_ra>
